<compile_context>
chip_gen: v5e
topology: v5e:2x2
jax: 0.10.0
libtpu: 0.0.40
codegen_flags: <defaults>
</compile_context>

<pallas_src>
import functools

import jax
import jax.numpy as jnp
from jax.experimental import pallas as pl
from jax.experimental.pallas import tpu as pltpu

HW1 = 14 * 14          # 196 spatial positions of the 14x14 feature map
C_IN = 512             # resnet embedding size
C1 = 48                # conv1 output channels (== search_info channels)
CP = 3                 # pointwise output channels
H1 = 60                # hidden width of the linear stack
TB_MAX = 16            # max batch elements per grid step


# ----------------------------------------------------------------------------
# Kernel 1: conv1(1x1) + ReLU + pointwise(1x1) + ReLU, one batch tile per step.
# feat arrives in native (tb, 512, 196) f32 layout and is cast to bf16 per
# batch element; the search_info half of the pointwise conv is the precomputed
# per-batch (3,1) vector spw (spatially constant -> lane broadcast).
# ----------------------------------------------------------------------------
def _conv_head_kernel(feat_ref, spw_ref, wc1_ref, bc1_ref, wpwa_ref, pw_ref, *, tb):
    w1 = wc1_ref[...]          # (48, 512) bf16
    b1 = bc1_ref[...]          # (48, 1)   f32
    wp = wpwa_ref[...]         # (3, 48)   f32
    for b in range(tb):        # static unroll, tb <= 16
        fb = feat_ref[b].astype(jnp.bfloat16)                         # (512, 196)
        rf = jnp.maximum(
            jnp.dot(w1, fb, preferred_element_type=jnp.float32) + b1, 0.0)   # (48, 196)
        pwb = (jnp.dot(wp, rf, preferred_element_type=jnp.float32)
               + spw_ref[b])                                          # (3, 196)
        pw_ref[b] = jnp.maximum(pwb, 0.0)


# ----------------------------------------------------------------------------
# Kernel 2: Linear(588, 60) + ReLU + Linear(60, 48), batch on sublanes.
# ----------------------------------------------------------------------------
def _mlp_kernel(x_ref, w1_ref, b1_ref, w2_ref, b2_ref, o_ref):
    h = jnp.maximum(
        jnp.dot(x_ref[...], w1_ref[...], preferred_element_type=jnp.float32)
        + b1_ref[...], 0.0)                                           # (tb, 60)
    o_ref[...] = (jnp.dot(h, w2_ref[...], preferred_element_type=jnp.float32)
                  + b2_ref[...])                                      # (tb, 48)


# ----------------------------------------------------------------------------
# Parameter init (deterministic) — shapes follow the torch module __init__.
# ----------------------------------------------------------------------------
def init_params(key):
    ks = jax.random.split(key, 8)

    def nrm(k, shape, scale=0.05):
        return (scale * jax.random.normal(k, shape)).astype(jnp.float32)

    return dict(
        conv1_w=nrm(ks[0], (C1, C_IN)),       # Conv2d(512, 48, 1) weight (1x1 squeezed)
        conv1_b=nrm(ks[1], (C1,)),
        pw_w=nrm(ks[2], (CP, 2 * C1)),        # Conv2d(96, 3, 1)
        pw_b=nrm(ks[3], (CP,)),
        l1_w=nrm(ks[4], (H1, CP * HW1)),      # Linear(588, 60)
        l1_b=nrm(ks[5], (H1,)),
        l2_w=nrm(ks[6], (C1, H1)),            # Linear(60, 48)
        l2_b=nrm(ks[7], (C1,)),
    )


# ----------------------------------------------------------------------------
# Wrapper: two pallas_calls (conv head, linear tail), native-layout feat.
# ----------------------------------------------------------------------------
def model_head_forward(feat_ext, search_info, p):
    """feat_ext: (B, 512, 14, 14) float32, search_info: (B, 48) float32."""
    B = feat_ext.shape[0]
    tb = B if B <= TB_MAX else TB_MAX
    Bp = ((B + tb - 1) // tb) * tb            # only copies feat if B % tb != 0
    n_blk = Bp // tb

    # Native layout: (B, 512, 196) row-major — reshape is free, no relayout.
    feat = feat_ext.reshape(B, C_IN, HW1)
    # Pointwise contribution of the (spatially constant) search tile + bias.
    spw = (search_info.astype(jnp.float32) @ p['pw_w'][:, C1:].T
           + p['pw_b'])                                                # (B, 3)
    if Bp != B:
        feat = jnp.pad(feat, ((0, Bp - B), (0, 0), (0, 0)))
        spw = jnp.pad(spw, ((0, Bp - B), (0, 0)))
    spw = spw.reshape(Bp, CP, 1)

    wc1 = p['conv1_w'].astype(jnp.bfloat16)   # (48, 512)
    bc1 = p['conv1_b'].reshape(C1, 1)
    wpwa = p['pw_w'][:, :C1]                  # (3, 48) acts on reduced_feat

    def const2(shape):
        return pl.BlockSpec(shape, lambda i: (0, 0))

    pw = pl.pallas_call(
        functools.partial(_conv_head_kernel, tb=tb),
        grid=(n_blk,),
        in_specs=[
            pl.BlockSpec((tb, C_IN, HW1), lambda i: (i, 0, 0)),   # feat (native f32)
            pl.BlockSpec((tb, CP, 1), lambda i: (i, 0, 0)),       # spw
            const2((C1, C_IN)),                                   # conv1 weight (bf16)
            const2((C1, 1)),                                      # conv1 bias
            const2((CP, C1)),                                     # pointwise weight A
        ],
        out_specs=pl.BlockSpec((tb, CP, HW1), lambda i: (i, 0, 0)),
        out_shape=jax.ShapeDtypeStruct((Bp, CP, HW1), jnp.float32),
        compiler_params=pltpu.CompilerParams(
            dimension_semantics=("parallel",),
            vmem_limit_bytes=32 * 1024 * 1024),
    )(feat, spw, wc1, bc1, wpwa)

    # Flatten (Bp, 3, 196) -> (Bp, 588): row-major collapse, matches torch's
    # combined_feat.view(B, -1) ordering (index = c*196 + hw). Tiny tensor.
    x = pw.reshape(Bp, CP * HW1)

    wl1 = p['l1_w'].T                         # (588, 60)
    b1 = p['l1_b'].reshape(1, H1)
    w2t = p['l2_w'].T                         # (60, 48)
    b2 = p['l2_b'].reshape(1, C1)

    logits = pl.pallas_call(
        _mlp_kernel,
        grid=(n_blk,),
        in_specs=[
            pl.BlockSpec((tb, CP * HW1), lambda i: (i, 0)),
            const2((CP * HW1, H1)),
            const2((1, H1)),
            const2((H1, C1)),
            const2((1, C1)),
        ],
        out_specs=pl.BlockSpec((tb, C1), lambda i: (i, 0)),
        out_shape=jax.ShapeDtypeStruct((Bp, C1), jnp.float32),
        compiler_params=pltpu.CompilerParams(
            dimension_semantics=("parallel",)),
    )(x, wl1, b1, w2t, b2)

    return logits[:B]


# ----------------------------------------------------------------------------
# Pure-JAX reference of the same head (mirrors the torch forward exactly, f32).
# ----------------------------------------------------------------------------
def reference_head(feat_ext, search_info, p):
    B = feat_ext.shape[0]
    f = feat_ext.reshape(B, C_IN, HW1)
    rf = jax.nn.relu(jnp.einsum('oc,bcp->bop', p['conv1_w'], f)
                     + p['conv1_b'][None, :, None])                  # (B,48,196)
    s_tile = jnp.broadcast_to(search_info[:, :, None], (B, C1, HW1))
    cat = jnp.concatenate([rf, s_tile], axis=1)                      # (B,96,196)
    pw = jax.nn.relu(jnp.einsum('oc,bcp->bop', p['pw_w'], cat)
                     + p['pw_b'][None, :, None])                     # (B,3,196)
    out = pw.reshape(B, CP * HW1)
    h = jax.nn.relu(out @ p['l1_w'].T + p['l1_b'])
    logits = h @ p['l2_w'].T + p['l2_b']
    return logits


if __name__ == "__main__":
    key = jax.random.PRNGKey(0)
    k_feat, k_sinfo, k_params = jax.random.split(key, 3)

    B = 2
    feat_ext = jax.random.normal(k_feat, (B, C_IN, 14, 14), dtype=jnp.float32)
    search_info = jax.random.uniform(k_sinfo, (B, C1), dtype=jnp.float32)
    params = init_params(k_params)

    logits = model_head_forward(feat_ext, search_info, params)
    logits = jax.block_until_ready(logits)

    ref_logits = reference_head(feat_ext, search_info, params)
    assert logits.shape == (B, C1)
    # feat / conv1 weight are bf16 on the MXU (f32 accumulation) -> loose tol.
    assert jnp.allclose(logits, ref_logits, atol=2e-2, rtol=2e-2), (
        float(jnp.max(jnp.abs(logits - ref_logits))))

    print("KERNEL_OK")
</pallas_src>

<mosaic_0001>
module attributes {stable_mosaic.version = 11 : i64} {
  func.func @_conv_head_kernel(%arg0: i32, %arg1: memref<2x512x196xf32, #tpu.memory_space<vmem>>, %arg2: memref<2x3x1xf32, #tpu.memory_space<vmem>>, %arg3: memref<48x512xbf16, #tpu.memory_space<vmem>>, %arg4: memref<48x1xf32, #tpu.memory_space<vmem>>, %arg5: memref<3x48xf32, #tpu.memory_space<vmem>>, %arg6: memref<2x3x196xf32, #tpu.memory_space<vmem>>) attributes {dimension_semantics = [#tpu.dimension_semantics<parallel>], iteration_bounds = array<i64: 1>, scalar_prefetch = 0 : i64, scratch_operands = 0 : i64, tpu.core_type = #tpu.core_type<tc>, window_params = [{transform_indices = @transform_0, window_bounds = array<i64: 2, 512, 196>}, {transform_indices = @transform_1, window_bounds = array<i64: 2, 3, 1>}, {pipeline_mode = #tpu.pipeline_mode<synchronous>, transform_indices = @transform_2, window_bounds = array<i64: 48, 512>}, {pipeline_mode = #tpu.pipeline_mode<synchronous>, transform_indices = @transform_3, window_bounds = array<i64: 48, 1>}, {pipeline_mode = #tpu.pipeline_mode<synchronous>, transform_indices = @transform_4, window_bounds = array<i64: 3, 48>}, {transform_indices = @transform_5, window_bounds = array<i64: 2, 3, 196>}]} {
    %c0 = arith.constant 0 : index
    %c0_0 = arith.constant 0 : index
    %0 = vector.load %arg3[%c0, %c0_0] : memref<48x512xbf16, #tpu.memory_space<vmem>>, vector<48x512xbf16>
    %c0_1 = arith.constant 0 : index
    %c0_2 = arith.constant 0 : index
    %1 = vector.load %arg4[%c0_1, %c0_2] : memref<48x1xf32, #tpu.memory_space<vmem>>, vector<48x1xf32>
    %c0_3 = arith.constant 0 : index
    %c0_4 = arith.constant 0 : index
    %2 = vector.load %arg5[%c0_3, %c0_4] : memref<3x48xf32, #tpu.memory_space<vmem>>, vector<3x48xf32>
    %c0_5 = arith.constant 0 : index
    %c0_6 = arith.constant 0 : index
    %c0_7 = arith.constant 0 : index
    %3 = vector.load %arg1[%c0_5, %c0_6, %c0_7] : memref<2x512x196xf32, #tpu.memory_space<vmem>>, vector<1x512x196xf32>
    %4 = vector.shape_cast %3 : vector<1x512x196xf32> to vector<512x196xf32>
    %5 = arith.truncf %4 : vector<512x196xf32> to vector<512x196xbf16>
    %cst = arith.constant dense<0.000000e+00> : vector<48x196xf32>
    %6 = tpu.matmul %0, %5, %cst {dimension_numbers = #tpu.dot_dimension_numbers<[1], [0], [0], [1], [0, 0, 1, 1], [], []>} : vector<48x512xbf16>, vector<512x196xbf16>, vector<48x196xf32> -> vector<48x196xf32>
    %7 = vector.broadcast %1 : vector<48x1xf32> to vector<48x196xf32>
    %8 = arith.addf %6, %7 : vector<48x196xf32>
    %cst_8 = arith.constant 0.000000e+00 : f32
    %9 = vector.broadcast %cst_8 : f32 to vector<48x196xf32>
    %10 = arith.maximumf %8, %9 : vector<48x196xf32>
    %cst_9 = arith.constant dense<0.000000e+00> : vector<3x196xf32>
    %11 = tpu.matmul %2, %10, %cst_9 {dimension_numbers = #tpu.dot_dimension_numbers<[1], [0], [0], [1], [0, 0, 1, 1], [], []>} : vector<3x48xf32>, vector<48x196xf32>, vector<3x196xf32> -> vector<3x196xf32>
    %c0_10 = arith.constant 0 : index
    %c0_11 = arith.constant 0 : index
    %c0_12 = arith.constant 0 : index
    %12 = vector.load %arg2[%c0_10, %c0_11, %c0_12] : memref<2x3x1xf32, #tpu.memory_space<vmem>>, vector<1x3x1xf32>
    %13 = vector.shape_cast %12 : vector<1x3x1xf32> to vector<3x1xf32>
    %14 = vector.broadcast %13 : vector<3x1xf32> to vector<3x196xf32>
    %15 = arith.addf %11, %14 : vector<3x196xf32>
    %cst_13 = arith.constant 0.000000e+00 : f32
    %16 = vector.broadcast %cst_13 : f32 to vector<3x196xf32>
    %17 = arith.maximumf %15, %16 : vector<3x196xf32>
    %c0_14 = arith.constant 0 : index
    %c0_15 = arith.constant 0 : index
    %c0_16 = arith.constant 0 : index
    %18 = vector.load %arg6[%c0_14, %c0_15, %c0_16] : memref<2x3x196xf32, #tpu.memory_space<vmem>>, vector<1x3x196xf32>
    %19 = vector.shape_cast %18 : vector<1x3x196xf32> to vector<3x196xf32>
    %20 = vector.shape_cast %17 : vector<3x196xf32> to vector<1x3x196xf32>
    tpu.vector_store %arg6[%c0_14, %c0_15, %c0_16], %20 {strides = array<i32>} : memref<2x3x196xf32, #tpu.memory_space<vmem>>, vector<1x3x196xf32>,
    %c1 = arith.constant 1 : index
    %c0_17 = arith.constant 0 : index
    %c0_18 = arith.constant 0 : index
    %21 = vector.load %arg1[%c1, %c0_17, %c0_18] : memref<2x512x196xf32, #tpu.memory_space<vmem>>, vector<1x512x196xf32>
    %22 = vector.shape_cast %21 : vector<1x512x196xf32> to vector<512x196xf32>
    %23 = arith.truncf %22 : vector<512x196xf32> to vector<512x196xbf16>
    %cst_19 = arith.constant dense<0.000000e+00> : vector<48x196xf32>
    %24 = tpu.matmul %0, %23, %cst_19 {dimension_numbers = #tpu.dot_dimension_numbers<[1], [0], [0], [1], [0, 0, 1, 1], [], []>} : vector<48x512xbf16>, vector<512x196xbf16>, vector<48x196xf32> -> vector<48x196xf32>
    %25 = vector.broadcast %1 : vector<48x1xf32> to vector<48x196xf32>
    %26 = arith.addf %24, %25 : vector<48x196xf32>
    %cst_20 = arith.constant 0.000000e+00 : f32
    %27 = vector.broadcast %cst_20 : f32 to vector<48x196xf32>
    %28 = arith.maximumf %26, %27 : vector<48x196xf32>
    %cst_21 = arith.constant dense<0.000000e+00> : vector<3x196xf32>
    %29 = tpu.matmul %2, %28, %cst_21 {dimension_numbers = #tpu.dot_dimension_numbers<[1], [0], [0], [1], [0, 0, 1, 1], [], []>} : vector<3x48xf32>, vector<48x196xf32>, vector<3x196xf32> -> vector<3x196xf32>
    %c1_22 = arith.constant 1 : index
    %c0_23 = arith.constant 0 : index
    %c0_24 = arith.constant 0 : index
    %30 = vector.load %arg2[%c1_22, %c0_23, %c0_24] : memref<2x3x1xf32, #tpu.memory_space<vmem>>, vector<1x3x1xf32>
    %31 = vector.shape_cast %30 : vector<1x3x1xf32> to vector<3x1xf32>
    %32 = vector.broadcast %31 : vector<3x1xf32> to vector<3x196xf32>
    %33 = arith.addf %29, %32 : vector<3x196xf32>
    %cst_25 = arith.constant 0.000000e+00 : f32
    %34 = vector.broadcast %cst_25 : f32 to vector<3x196xf32>
    %35 = arith.maximumf %33, %34 : vector<3x196xf32>
    %c1_26 = arith.constant 1 : index
    %c0_27 = arith.constant 0 : index
    %c0_28 = arith.constant 0 : index
    %36 = vector.load %arg6[%c1_26, %c0_27, %c0_28] : memref<2x3x196xf32, #tpu.memory_space<vmem>>, vector<1x3x196xf32>
    %37 = vector.shape_cast %36 : vector<1x3x196xf32> to vector<3x196xf32>
    %38 = vector.shape_cast %35 : vector<3x196xf32> to vector<1x3x196xf32>
    tpu.vector_store %arg6[%c1_26, %c0_27, %c0_28], %38 {strides = array<i32>} : memref<2x3x196xf32, #tpu.memory_space<vmem>>, vector<1x3x196xf32>,
    return
  }
  func.func @transform_0(%arg0: i32) -> (i32, i32, i32) {
    %c0_i32 = arith.constant 0 : i32
    %c0_i32_0 = arith.constant 0 : i32
    %c0_i32_1 = arith.constant 0 : i32
    return %arg0, %c0_i32, %c0_i32_0 : i32, i32, i32
  }
  func.func @transform_1(%arg0: i32) -> (i32, i32, i32) {
    %c0_i32 = arith.constant 0 : i32
    %c0_i32_0 = arith.constant 0 : i32
    %c0_i32_1 = arith.constant 0 : i32
    return %arg0, %c0_i32, %c0_i32_0 : i32, i32, i32
  }
  func.func @transform_2(%arg0: i32) -> (i32, i32) {
    %c0_i32 = arith.constant 0 : i32
    %c0_i32_0 = arith.constant 0 : i32
    %c0_i32_1 = arith.constant 0 : i32
    return %c0_i32, %c0_i32_0 : i32, i32
  }
  func.func @transform_3(%arg0: i32) -> (i32, i32) {
    %c0_i32 = arith.constant 0 : i32
    %c0_i32_0 = arith.constant 0 : i32
    %c0_i32_1 = arith.constant 0 : i32
    return %c0_i32, %c0_i32_0 : i32, i32
  }
  func.func @transform_4(%arg0: i32) -> (i32, i32) {
    %c0_i32 = arith.constant 0 : i32
    %c0_i32_0 = arith.constant 0 : i32
    %c0_i32_1 = arith.constant 0 : i32
    return %c0_i32, %c0_i32_0 : i32, i32
  }
  func.func @transform_5(%arg0: i32) -> (i32, i32, i32) {
    %c0_i32 = arith.constant 0 : i32
    %c0_i32_0 = arith.constant 0 : i32
    %c0_i32_1 = arith.constant 0 : i32
    return %arg0, %c0_i32, %c0_i32_0 : i32, i32, i32
  }
}

</mosaic_0001>

<bundles_post_ra>
// kernel: tpu_custom_call.1
= control target key start
LH: loop header
LB: loop body
LE: loop exit
PB: predicated region body
PF: predicated region fallthrough
CT: control target
= control target key end

     0   :  { %vm531_vm0 = vcmask 392192   ;;  %vm583_vm1 = vcmask 1042432   ;;  %vm584_vm2 = vcmask 555012   ;;  %vm580_vm3 = vcmask 1043456   ;;  %s2313_s0 = inlined_call_operand.vmem [shape: f32[2,512,196], index: 0, kind: input, shape index: {}]   ;;  %s2314_s2 = inlined_call_operand.vmem [shape: bf16[48,512], index: 2, kind: input, shape index: {}]   ;;  %s2315_s3 = inlined_call_operand.vmem [shape: f32[48,1], index: 3, kind: input, shape index: {}]   ;;  %s2316_s1 = inlined_call_operand.vmem [shape: f32[2,3,1], index: 1, kind: input, shape index: {}]   ;;  %s2317_s4 = inlined_call_operand.vmem [shape: f32[3,48], index: 4, kind: input, shape index: {}]   ;;  %s2318_s5 = inlined_call_operand.vmem [shape: f32[2,3,196], index: 5, kind: output, shape index: {}]  }
   0x1   :  { %v67_v0 = vld [vmem:[%s2313_s0 + $0xe0] sm:$0xff]  ;;  %v69_v1 = vld [vmem:[%s2313_s0 + $0xf0] sm:$0xff]  ;;  %vm2272_vm4 = vmor %vm584_vm2, %vm583_vm1 }
   0x2   :  { %v99_v2 = vld [vmem:[%s2313_s0 + $0x1e0] sm:$0xff]  ;;  %v181_v3 = vpack.c.bf16 %v69_v1, %v67_v0  ;;  %v101_v4 = vld [vmem:[%s2313_s0 + $0x1f0] sm:$0xff] }
   0x3   :  { %v131_v5 = vld [vmem:[%s2313_s0 + $0x2e0] sm:$0xff]  ;;  %v133_v6 = vld [vmem:[%s2313_s0 + $0x2f0] sm:$0xff]  ;;  %v197_v7 = vpack.c.bf16 %v101_v4, %v99_v2 }
   0x4   :  { %v213_v8 = vpack.c.bf16 %v133_v6, %v131_v5  ;;  %v163_v9 = vld [vmem:[%s2313_s0 + $0x3e0] sm:$0xff]  ;;  %v165_v10 = vld [vmem:[%s2313_s0 + $0x3f0] sm:$0xff]  ;;  %321 = vmatpush.bf16.msra.mxu0 %v181_v3 }
   0x5   :  { %v63_v11 = vld [vmem:[%s2313_s0 + $0xc0] sm:$0xff]  ;;  %v229_v12 = vpack.c.bf16 %v165_v10, %v163_v9  ;;  %v65_v13 = vld [vmem:[%s2313_s0 + $0xd0] sm:$0xff]  ;;  %345 = vmatpush.bf16.msra.mxu1 %v197_v7 }
   0x6   :  { %v95_v14 = vld [vmem:[%s2313_s0 + $0x1c0] sm:$0xff]  ;;  %v97_v15 = vld [vmem:[%s2313_s0 + $0x1d0] sm:$0xff]  ;;  %369 = vmatpush.bf16.msra.mxu2 %v213_v8  ;;  %v179_v16 = vpack.c.bf16 %v65_v13, %v63_v11 }
   0x7   :  { %v195_v17 = vpack.c.bf16 %v97_v15, %v95_v14  ;;  %v127_v18 = vld [vmem:[%s2313_s0 + $0x2c0] sm:$0xff]  ;;  %v129_v19 = vld [vmem:[%s2313_s0 + $0x2d0] sm:$0xff]  ;;  %393 = vmatpush.bf16.msra.mxu3 %v229_v12  ;;  %v1242_v14 = vmov 0  }
   0x8   :  { %v159_v20 = vld [vmem:[%s2313_s0 + $0x3c0] sm:$0xff]  ;;  %v211_v21 = vpack.c.bf16 %v129_v19, %v127_v18  ;;  %v161_v22 = vld [vmem:[%s2313_s0 + $0x3d0] sm:$0xff]  ;;  %322 = vmatpush.bf16.msra.mxu0 %v179_v16  ;;  %1240 = vset.pattern.permute.xlu1 %v1242_v14 }
   0x9   :  { %v59_v23 = vld [vmem:[%s2313_s0 + $0xa0] sm:$0xff]  ;;  %v61_v24 = vld [vmem:[%s2313_s0 + $0xb0] sm:$0xff]  ;;  %v227_v25 = vpack.c.bf16 %v161_v22, %v159_v20  ;;  %346 = vmatpush.bf16.msra.mxu1 %v195_v17  ;;  %1241 = vset.pattern.permute.xlu2 %v1242_v14 }
   0xa   :  { %v91_v26 = vld [vmem:[%s2313_s0 + $0x1a0] sm:$0xff]  ;;  %v93_v27 = vld [vmem:[%s2313_s0 + $0x1b0] sm:$0xff]  ;;  %v177_v29 = vpack.c.bf16 %v61_v24, %v59_v23  ;;  %370 = vmatpush.bf16.msra.mxu2 %v211_v21  ;;  %1239 = vset.pattern.permute.xlu0 %v1242_v14  ;;  %v126_v14 = vld [vmem:[%s2313_s0 + $0x2b8] sm:$0xff] }
   0xb   :  { %v123_v28 = vld [vmem:[%s2313_s0 + $0x2a0] sm:$0xff]  ;;  %v125_v30 = vld [vmem:[%s2313_s0 + $0x2b0] sm:$0xff]  ;;  %v193_v33 = vpack.c.bf16 %v93_v27, %v91_v26  ;;  %394 = vmatpush.bf16.msra.mxu3 %v227_v25 }
   0xc   :  { %v155_v31 = vld [vmem:[%s2313_s0 + $0x3a0] sm:$0xff]  ;;  %v157_v32 = vld [vmem:[%s2313_s0 + $0x3b0] sm:$0xff]  ;;  %v209_v34 = vpack.c.bf16 %v125_v30, %v123_v28  ;;  %323 = vmatpush.bf16.msra.mxu0 %v177_v29 }
   0xd   :  { %v55_v35 = vld [vmem:[%s2313_s0 + $0x80] sm:$0xff]  ;;  %v57_v36 = vld [vmem:[%s2313_s0 + $0x90] sm:$0xff]  ;;  %v225_v38 = vpack.c.bf16 %v157_v32, %v155_v31  ;;  %347 = vmatpush.bf16.msra.mxu1 %v193_v33  ;;  %v1054_v33 = vld [vmem:[%s2314_s2 + $0x8] sm:$0xf] }
   0xe   :  { %v87_v37 = vld [vmem:[%s2313_s0 + $0x180] sm:$0xff]  ;;  %v89_v39 = vld [vmem:[%s2313_s0 + $0x190] sm:$0xff]  ;;  %v175_v44 = vpack.c.bf16 %v57_v36, %v55_v35  ;;  %371 = vmatpush.bf16.msra.mxu2 %v209_v34  ;;  %v1229_v34 = vld [vmem:[%s2314_s2 + $0x14] sm:$0xf0] }
   0xf   :  { %v119_v40 = vld [vmem:[%s2313_s0 + $0x280] sm:$0xff]  ;;  %v121_v41 = vld [vmem:[%s2313_s0 + $0x290] sm:$0xff]  ;;  %v191_v45 = vpack.c.bf16 %v89_v39, %v87_v37  ;;  %395 = vmatpush.bf16.msra.mxu3 %v225_v38  ;;  %v68_v35 = vld [vmem:[%s2313_s0 + $0xe8] sm:$0xff] }
  0x10   :  { %v151_v42 = vld [vmem:[%s2313_s0 + $0x380] sm:$0xff]  ;;  %v153_v43 = vld [vmem:[%s2313_s0 + $0x390] sm:$0xff]  ;;  %v207_v46 = vpack.c.bf16 %v121_v41, %v119_v40  ;;  %324 = vmatpush.bf16.msra.mxu0 %v175_v44  ;;  %v70_v37 = vld [vmem:[%s2313_s0 + $0xf8] sm:$0xff] }
  0x11   :  { %v51_v47 = vld [vmem:[%s2313_s0 + $0x60] sm:$0xff]  ;;  %v53_v48 = vld [vmem:[%s2313_s0 + $0x70] sm:$0xff]  ;;  %v223_v50 = vpack.c.bf16 %v153_v43, %v151_v42  ;;  %348 = vmatpush.bf16.msra.mxu1 %v191_v45  ;;  %v100_v38 = vld [vmem:[%s2313_s0 + $0x1e8] sm:$0xff] }
  0x12   :  { %v83_v49 = vld [vmem:[%s2313_s0 + $0x160] sm:$0xff]  ;;  %v85_v51 = vld [vmem:[%s2313_s0 + $0x170] sm:$0xff]  ;;  %v173_v56 = vpack.c.bf16 %v53_v48, %v51_v47  ;;  %372 = vmatpush.bf16.msra.mxu2 %v207_v46  ;;  %v102_v39 = vld [vmem:[%s2313_s0 + $0x1f8] sm:$0xff]  ;;  %v182_v46 = vpack.c.bf16 %v70_v37, %v68_v35 }
  0x13   :  { %v115_v52 = vld [vmem:[%s2313_s0 + $0x260] sm:$0xff]  ;;  %v117_v53 = vld [vmem:[%s2313_s0 + $0x270] sm:$0xff]  ;;  %v189_v57 = vpack.c.bf16 %v85_v51, %v83_v49  ;;  %396 = vmatpush.bf16.msra.mxu3 %v223_v50  ;;  %v1227_v42 = vld [vmem:[%s2314_s2 + $0xc] sm:$0xf]  ;;  %v198_v51 = vpack.c.bf16 %v102_v39, %v100_v38 }
  0x14   :  { %v147_v54 = vld [vmem:[%s2313_s0 + $0x360] sm:$0xff]  ;;  %v149_v55 = vld [vmem:[%s2313_s0 + $0x370] sm:$0xff]  ;;  %v205_v58 = vpack.c.bf16 %v117_v53, %v115_v52  ;;  %325 = vmatpush.bf16.msra.mxu0 %v173_v56  ;;  %v1056_v43 = vld [vmem:[%s2314_s2 + $0x18] sm:$0xf0]  ;;  %v1526_v56 = vor.u32 %v1229_v34, %v1054_v33 }
  0x15   :  { %v47_v59 = vld [vmem:[%s2313_s0 + $0x40] sm:$0xff]  ;;  %v49_v60 = vld [vmem:[%s2313_s0 + $0x50] sm:$0xff]  ;;  %v221_v62 = vpack.c.bf16 %v149_v55, %v147_v54  ;;  %349 = vmatpush.bf16.msra.mxu1 %v189_v57  ;;  %v132_v44 = vld [vmem:[%s2313_s0 + $0x2e8] sm:$0xff] }
  0x16   :  { %v79_v61 = vld [vmem:[%s2313_s0 + $0x140] sm:$0xff]  ;;  %v81_v63 = vld [vmem:[%s2313_s0 + $0x150] sm:$0xff]  ;;  %v171_v4 = vpack.c.bf16 %v49_v60, %v47_v59  ;;  %373 = vmatpush.bf16.msra.mxu2 %v205_v58  ;;  %v134_v47 = vld [vmem:[%s2313_s0 + $0x2f8] sm:$0xff]  ;;  %v1534_v59 = vor.u32 %v1227_v42, %v1056_v43 }
  0x17   :  { %v111_v0 = vld [vmem:[%s2313_s0 + $0x240] sm:$0xff]  ;;  %v113_v1 = vld [vmem:[%s2313_s0 + $0x250] sm:$0xff]  ;;  %v187_v5 = vpack.c.bf16 %v81_v63, %v79_v61  ;;  %397 = vmatpush.bf16.msra.mxu3 %v221_v62  ;;  %v164_v48 = vld [vmem:[%s2313_s0 + $0x3e8] sm:$0xff]  ;;  %v214_v60 = vpack.c.bf16 %v134_v47, %v132_v44 }
  0x18   :  { %v143_v2 = vld [vmem:[%s2313_s0 + $0x340] sm:$0xff]  ;;  %v145_v3 = vld [vmem:[%s2313_s0 + $0x350] sm:$0xff]  ;;  %v203_v6 = vpack.c.bf16 %v113_v1, %v111_v0  ;;  %326 = vmatpush.bf16.msra.mxu0 %v171_v4  ;;  %v35_v49 = vld [vmem:[%s2315_s3 + $0x18] sm:$0xff] }
  0x19   :  { %v43_v7 = vld [vmem:[%s2313_s0 + $0x20] sm:$0xff]  ;;  %v45_v8 = vld [vmem:[%s2313_s0 + $0x30] sm:$0xff]  ;;  %v219_v10 = vpack.c.bf16 %v145_v3, %v143_v2  ;;  %350 = vmatpush.bf16.msra.mxu1 %v187_v5  ;;  %v166_v52 = vld [vmem:[%s2313_s0 + $0x3f8] sm:$0xff]  ;;  %248 = vperm.xlu1 %1240, %v35_v49  }
  0x1a   :  { %v75_v9 = vld [vmem:[%s2313_s0 + $0x120] sm:$0xff]  ;;  %v77_v11 = vld [vmem:[%s2313_s0 + $0x130] sm:$0xff]  ;;  %v169_v18 = vpack.c.bf16 %v45_v8, %v43_v7  ;;  %374 = vmatpush.bf16.msra.mxu2 %v203_v6  ;;  %v64_v53 = vld [vmem:[%s2313_s0 + $0xc8] sm:$0xff]  ;;  %v230_v61 = vpack.c.bf16 %v166_v52, %v164_v48 }
  0x1b   :  { %v107_v12 = vld [vmem:[%s2313_s0 + $0x220] sm:$0xff]  ;;  %v109_v13 = vld [vmem:[%s2313_s0 + $0x230] sm:$0xff]  ;;  %v185_v22 = vpack.c.bf16 %v77_v11, %v75_v9  ;;  %398 = vmatpush.bf16.msra.mxu3 %v219_v10  ;;  %v66_v54 = vld [vmem:[%s2313_s0 + $0xd8] sm:$0xff] }
  0x1c   :  { %v139_v15 = vld [vmem:[%s2313_s0 + $0x320] sm:$0xff]  ;;  %v141_v16 = vld [vmem:[%s2313_s0 + $0x330] sm:$0xff]  ;;  %v201_v23 = vpack.c.bf16 %v109_v13, %v107_v12  ;;  %327 = vmatpush.bf16.msra.mxu0 %v169_v18  ;;  %v96_v57 = vld [vmem:[%s2313_s0 + $0x1c8] sm:$0xff]  ;;  %v180_v62 = vpack.c.bf16 %v66_v54, %v64_v53 }
  0x1d   :  { %v39_v17 = vld [vmem:[%s2313_s0] sm:$0xff]  ;;  %v41_v19 = vld [vmem:[%s2313_s0 + $0x10] sm:$0xff]  ;;  %v217_v27 = vpack.c.bf16 %v141_v16, %v139_v15  ;;  %351 = vmatpush.bf16.msra.mxu1 %v185_v22  ;;  %v98_v58 = vld [vmem:[%s2313_s0 + $0x1d8] sm:$0xff] }
  0x1e   :  { %v71_v20 = vld [vmem:[%s2313_s0 + $0x100] sm:$0xff]  ;;  %v73_v21 = vld [vmem:[%s2313_s0 + $0x110] sm:$0xff]  ;;  %v167_v36 = vpack.c.bf16 %v41_v19, %v39_v17  ;;  %375 = vmatpush.bf16.msra.mxu2 %v201_v23  ;;  %v128_v63 = vld [vmem:[%s2313_s0 + $0x2c8] sm:$0xff]  ;;  %v196_v2 = vpack.c.bf16 %v98_v58, %v96_v57 }
  0x1f   :  { %v103_v24 = vld [vmem:[%s2313_s0 + $0x200] sm:$0xff]  ;;  %v105_v25 = vld [vmem:[%s2313_s0 + $0x210] sm:$0xff]  ;;  %v183_v40 = vpack.c.bf16 %v73_v21, %v71_v20  ;;  %399 = vmatpush.bf16.msra.mxu3 %v217_v27  ;;  %v130_v0 = vld [vmem:[%s2313_s0 + $0x2d8] sm:$0xff] }
  0x20   :  { %v135_v26 = vld [vmem:[%s2313_s0 + $0x300] sm:$0xff]  ;;  %v137_v28 = vld [vmem:[%s2313_s0 + $0x310] sm:$0xff]  ;;  %v199_v41 = vpack.c.bf16 %v105_v25, %v103_v24  ;;  %328 = vmatpush.bf16.msra.mxu0 %v167_v36  ;;  %v160_v1 = vld [vmem:[%s2313_s0 + $0x3c8] sm:$0xff]  ;;  %v212_v9 = vpack.c.bf16 %v130_v0, %v128_v63 }
  0x21   :  { %v1046_v29 = vld [vmem:[%s2314_s2] sm:$0xf]  ;;  %v1228_v30 = vld [vmem:[%s2314_s2 + $0xc] sm:$0xf0]  ;;  %v1226_v31 = vld [vmem:[%s2314_s2 + $0x4] sm:$0xf]  ;;  %v215_v45 = vpack.c.bf16 %v137_v28, %v135_v26  ;;  %352 = vmatpush.bf16.msra.mxu1 %v183_v40 }
  0x22   :  { %v1048_v32 = vld [vmem:[%s2314_s2 + $0x10] sm:$0xf0]  ;;  %v1513_v50 = vor.u32 %v1228_v30, %v1046_v29  ;;  %376 = vmatpush.bf16.msra.mxu2 %v199_v41  ;;  %v162_v3 = vld [vmem:[%s2313_s0 + $0x3d8] sm:$0xff]  ;;  %v60_v4 = vld [vmem:[%s2313_s0 + $0xa8] sm:$0xff] }
  0x23   :  { %v1524_v55 = vor.u32 %v1226_v31, %v1048_v32  ;;  %400 = vmatpush.bf16.msra.mxu3 %v215_v45  ;;  %v62_v5 = vld [vmem:[%s2313_s0 + $0xb8] sm:$0xff]  ;;  %v92_v6 = vld [vmem:[%s2313_s0 + $0x1a8] sm:$0xff]  ;;  %v34_v8 = vld [vmem:[%s2315_s3 + $0x10] sm:$0xff]  ;;  %v228_v11 = vpack.c.bf16 %v162_v3, %v160_v1 }
  0x24   :  { %417 = vmatpush.bf16.msrb.mxu0 %v182_v46  ;;  %v94_v7 = vld [vmem:[%s2313_s0 + $0x1b8] sm:$0xff]  ;;  %v33_v10 = vld [vmem:[%s2315_s3 + $0x8] sm:$0xff]  ;;  %v178_v12 = vpack.c.bf16 %v62_v5, %v60_v4  ;;  %243 = vperm.xlu1 %1240, %v34_v8   ;;  %v1062_v23 = vld [vmem:[%s2314_s2 + $0x20] sm:$0xf] }
  0x25   :  { %329 = vmatmul.bf16.vlgmr.msra.gmra.mxu0 %v1513_v50  ;;  %441 = vmatpush.bf16.msrb.mxu1 %v198_v51  ;;  %v124_v13 = vld [vmem:[%s2313_s0 + $0x2a8] sm:$0xff]  ;;  %v194_v16 = vpack.c.bf16 %v94_v7, %v92_v6  ;;  %v158_v17 = vld [vmem:[%s2313_s0 + $0x3b8] sm:$0xff]  ;;  %v1232_v24 = vld [vmem:[%s2314_s2 + $0x2c] sm:$0xf0] }
  0x26   :  { %353 = vmatmul.bf16.vlgmr.msra.gmra.mxu1 %v1524_v55  ;;  %377 = vmatmul.bf16.vlgmr.msra.gmra.mxu2 %v1526_v56  ;;  %v156_v15 = vld [vmem:[%s2313_s0 + $0x3a8] sm:$0xff]  ;;  %v58_v19 = vld [vmem:[%s2313_s0 + $0x98] sm:$0xff]  ;;  %v210_v22 = vpack.c.bf16 %v126_v14, %v124_v13  ;;  %v1230_v30 = vld [vmem:[%s2314_s2 + $0x24] sm:$0xf]  ;;  %v1657_v51 = vor.u32 %v1232_v24, %v1062_v23 }
  0x27   :  { %401 = vmatmul.bf16.vlgmr.msra.gmra.mxu3 %v1534_v59  ;;  %465 = vmatpush.bf16.msrb.mxu2 %v214_v60  ;;  %v56_v18 = vld [vmem:[%s2313_s0 + $0x88] sm:$0xff]  ;;  %v90_v21 = vld [vmem:[%s2313_s0 + $0x198] sm:$0xff]  ;;  %v226_v25 = vpack.c.bf16 %v158_v17, %v156_v15  ;;  %v1064_v31 = vld [vmem:[%s2314_s2 + $0x30] sm:$0xf0] }
  0x28   :  { %489 = vmatpush.bf16.msrb.mxu3 %v230_v61  ;;  %418 = vmatpush.bf16.msrb.mxu0 %v180_v62  ;;  %v88_v20 = vld [vmem:[%s2313_s0 + $0x188] sm:$0xff]  ;;  %v176_v26 = vpack.c.bf16 %v58_v19, %v56_v18  ;;  %v122_v28 = vld [vmem:[%s2313_s0 + $0x298] sm:$0xff]  ;;  %v32_v44 = vld [vmem:[%s2315_s3] sm:$0xff]  ;;  %v1668_v58 = vor.u32 %v1230_v30, %v1064_v31 }
  0x29   :  { %442 = vmatpush.bf16.msrb.mxu1 %v196_v2  ;;  %238 = vperm.xlu2 %1241, %v33_v10   ;;  %v120_v27 = vld [vmem:[%s2313_s0 + $0x288] sm:$0xff]  ;;  %v1233_v33 = vld [vmem:[%s2314_s2 + $0x34] sm:$0xf0]  ;;  %v192_v34 = vpack.c.bf16 %v90_v21, %v88_v20  ;;  %v1072_v42 = vld [vmem:[%s2314_s2 + $0x38] sm:$0xf0] }
  0x2a   :  { %v152_v29 = vld [vmem:[%s2313_s0 + $0x388] sm:$0xff]  ;;  %v154_v35 = vld [vmem:[%s2313_s0 + $0x398] sm:$0xff]  ;;  %v208_v43 = vpack.c.bf16 %v122_v28, %v120_v27 }
  0x2b   :  { %466 = vmatpush.bf16.msrb.mxu2 %v212_v9  ;;  %v1070_v32 = vld [vmem:[%s2314_s2 + $0x28] sm:$0xf]  ;;  %v54_v37 = vld [vmem:[%s2313_s0 + $0x78] sm:$0xff]  ;;  %v1231_v41 = vld [vmem:[%s2314_s2 + $0x2c] sm:$0xf]  ;;  %v224_v45 = vpack.c.bf16 %v154_v35, %v152_v29 }
  0x2c   :  { %490 = vmatpush.bf16.msrb.mxu3 %v228_v11  ;;  %419 = vmatpush.bf16.msrb.mxu0 %v178_v12  ;;  %v52_v36 = vld [vmem:[%s2313_s0 + $0x68] sm:$0xff]  ;;  %v86_v39 = vld [vmem:[%s2313_s0 + $0x178] sm:$0xff]  ;;  %v1670_v60 = vor.u32 %v1233_v33, %v1070_v32  ;;  %v1678_v63 = vor.u32 %v1231_v41, %v1072_v42  ;;  %v36_v12 = vld [vmem:[%s2315_s3 + $0x20] sm:$0xff] }
  0x2d   :  { %443 = vmatpush.bf16.msrb.mxu1 %v194_v16  ;;  %v84_v38 = vld [vmem:[%s2313_s0 + $0x168] sm:$0xff]  ;;  %v174_v46 = vpack.c.bf16 %v54_v37, %v52_v36  ;;  %v118_v48 = vld [vmem:[%s2313_s0 + $0x278] sm:$0xff]  ;;  %v1078_v33 = vld [vmem:[%s2314_s2 + $0x40] sm:$0xf] }
  0x2e   :  { %v37_v40 = vld [vmem:[%s2315_s3 + $0x28] sm:$0xff]  ;;  %v190_v52 = vpack.c.bf16 %v86_v39, %v84_v38  ;;  %v150_v53 = vld [vmem:[%s2313_s0 + $0x378] sm:$0xff]  ;;  %v1234_v35 = vld [vmem:[%s2314_s2 + $0x44] sm:$0xf] }
  0x2f   :  { %467 = vmatpush.bf16.msrb.mxu2 %v210_v22  ;;  %258 = vperm.xlu0 %1239, %v37_v40   ;;  %v116_v47 = vld [vmem:[%s2313_s0 + $0x268] sm:$0xff]  ;;  %v50_v57 = vld [vmem:[%s2313_s0 + $0x58] sm:$0xff]  ;;  %v1080_v36 = vld [vmem:[%s2314_s2 + $0x50] sm:$0xf0] }
  0x30   :  { %491 = vmatpush.bf16.msrb.mxu3 %v226_v25  ;;  %420 = vmatpush.bf16.msrb.mxu0 %v176_v26  ;;  %v148_v49 = vld [vmem:[%s2313_s0 + $0x368] sm:$0xff]  ;;  %v82_v62 = vld [vmem:[%s2313_s0 + $0x158] sm:$0xff]  ;;  %v206_v0 = vpack.c.bf16 %v118_v48, %v116_v47  ;;  %v1122_v47 = vld [vmem:[%s2313_s0 + $0x4e0] sm:$0xff] }
  0x31   :  { %444 = vmatpush.bf16.msrb.mxu1 %v192_v34  ;;  %v48_v54 = vld [vmem:[%s2313_s0 + $0x48] sm:$0xff]  ;;  %233 = vperm.xlu2 %1241, %v32_v44   ;;  %v222_v1 = vpack.c.bf16 %v150_v53, %v148_v49  ;;  %v114_v4 = vld [vmem:[%s2313_s0 + $0x258] sm:$0xff]  ;;  %v1236_v34 = vld [vmem:[%s2314_s2 + $0x4c] sm:$0xf0]  ;;  %v1773_v44 = vor.u32 %v1234_v35, %v1080_v36 }
  0x32   :  { %v80_v61 = vld [vmem:[%s2313_s0 + $0x148] sm:$0xff]  ;;  %v172_v2 = vpack.c.bf16 %v50_v57, %v48_v54  ;;  %v146_v7 = vld [vmem:[%s2313_s0 + $0x358] sm:$0xff]  ;;  %v1124_v48 = vld [vmem:[%s2313_s0 + $0x4f0] sm:$0xff] }
  0x33   :  { %468 = vmatpush.bf16.msrb.mxu2 %v208_v43  ;;  %v112_v3 = vld [vmem:[%s2313_s0 + $0x248] sm:$0xff]  ;;  %v188_v6 = vpack.c.bf16 %v82_v62, %v80_v61  ;;  %v46_v9 = vld [vmem:[%s2313_s0 + $0x38] sm:$0xff]  ;;  %v1771_v43 = vor.u32 %v1236_v34, %v1078_v33  ;;  %v730_v49 = vpack.c.bf16 %v1124_v48, %v1122_v47  ;;  %v1156_v53 = vld [vmem:[%s2313_s0 + $0x5f0] sm:$0xff] }
  0x34   :  { %492 = vmatpush.bf16.msrb.mxu3 %v224_v45  ;;  %421 = vmatpush.bf16.msrb.mxu0 %v174_v46  ;;  %v144_v5 = vld [vmem:[%s2313_s0 + $0x348] sm:$0xff]  ;;  %v78_v11 = vld [vmem:[%s2313_s0 + $0x138] sm:$0xff]  ;;  %v204_v13 = vpack.c.bf16 %v114_v4, %v112_v3  ;;  %v1118_v54 = vld [vmem:[%s2313_s0 + $0x4c0] sm:$0xff] }
  0x35   :  { %334 = vmatmul.bf16.gmra.mxu0 %v1657_v51  ;;  %445 = vmatpush.bf16.msrb.mxu1 %v190_v52  ;;  %v44_v8 = vld [vmem:[%s2313_s0 + $0x28] sm:$0xff]  ;;  %v220_v14 = vpack.c.bf16 %v146_v7, %v144_v5  ;;  %v110_v17 = vld [vmem:[%s2313_s0 + $0x238] sm:$0xff]  ;;  %v1154_v52 = vld [vmem:[%s2313_s0 + $0x5e0] sm:$0xff] }
  0x36   :  { %358 = vmatmul.bf16.gmra.mxu1 %v1668_v58  ;;  %382 = vmatmul.bf16.gmra.mxu2 %v1670_v60  ;;  %v76_v10 = vld [vmem:[%s2313_s0 + $0x128] sm:$0xff]  ;;  %v170_v15 = vpack.c.bf16 %v46_v9, %v44_v8  ;;  %v142_v20 = vld [vmem:[%s2313_s0 + $0x338] sm:$0xff]  ;;  %v746_v57 = vpack.c.bf16 %v1156_v53, %v1154_v52  ;;  %v1120_v61 = vld [vmem:[%s2313_s0 + $0x4d0] sm:$0xff] }
  0x37   :  { %406 = vmatmul.bf16.gmra.mxu3 %v1678_v63  ;;  %469 = vmatpush.bf16.msrb.mxu2 %v206_v0  ;;  %v108_v16 = vld [vmem:[%s2313_s0 + $0x228] sm:$0xff]  ;;  %v186_v19 = vpack.c.bf16 %v78_v11, %v76_v10  ;;  %v42_v22 = vld [vmem:[%s2313_s0 + $0x18] sm:$0xff]  ;;  %v1150_v62 = vld [vmem:[%s2313_s0 + $0x5c0] sm:$0xff] }
  0x38   :  { %493 = vmatpush.bf16.msrb.mxu3 %v222_v1  ;;  %422 = vmatpush.bf16.msrb.mxu0 %v172_v2  ;;  %v140_v18 = vld [vmem:[%s2313_s0 + $0x328] sm:$0xff]  ;;  %v74_v24 = vld [vmem:[%s2313_s0 + $0x118] sm:$0xff]  ;;  %v202_v25 = vpack.c.bf16 %v110_v17, %v108_v16  ;;  %v1152_v0 = vld [vmem:[%s2313_s0 + $0x5d0] sm:$0xff]  ;;  %v728_v1 = vpack.c.bf16 %v1120_v61, %v1118_v54 }
  0x39   :  { %446 = vmatpush.bf16.msrb.mxu1 %v188_v6  ;;  %253 = vperm.xlu0 %1239, %v36_v12   ;;  %v40_v21 = vld [vmem:[%s2313_s0 + $0x8] sm:$0xff]  ;;  %v218_v26 = vpack.c.bf16 %v142_v20, %v140_v18  ;;  %v106_v29 = vld [vmem:[%s2313_s0 + $0x218] sm:$0xff]  ;;  %v1114_v2 = vld [vmem:[%s2313_s0 + $0x4a0] sm:$0xff]  ;;  %v744_v4 = vpack.c.bf16 %v1152_v0, %v1150_v62 }
  0x3a   :  { %v72_v23 = vld [vmem:[%s2313_s0 + $0x108] sm:$0xff]  ;;  %v168_v27 = vpack.c.bf16 %v42_v22, %v40_v21  ;;  %v138_v32 = vld [vmem:[%s2313_s0 + $0x318] sm:$0xff]  ;;  %v1116_v3 = vld [vmem:[%s2313_s0 + $0x4b0] sm:$0xff] }
  0x3b   :  { %470 = vmatpush.bf16.msrb.mxu2 %v204_v13  ;;  %v104_v28 = vld [vmem:[%s2313_s0 + $0x208] sm:$0xff]  ;;  %v184_v30 = vpack.c.bf16 %v74_v24, %v72_v23  ;;  %v1237_v38 = vld [vmem:[%s2314_s2 + $0x54] sm:$0xf0]  ;;  %v1088_v41 = vld [vmem:[%s2314_s2 + $0x58] sm:$0xf0]  ;;  %v726_v7 = vpack.c.bf16 %v1116_v3, %v1114_v2 }
  0x3c   :  { %494 = vmatpush.bf16.msrb.mxu3 %v220_v14  ;;  %423 = vmatpush.bf16.msrb.mxu0 %v170_v15  ;;  %v136_v31 = vld [vmem:[%s2313_s0 + $0x308] sm:$0xff]  ;;  %v200_v39 = vpack.c.bf16 %v106_v29, %v104_v28  ;;  %v1146_v5 = vld [vmem:[%s2313_s0 + $0x5a0] sm:$0xff]  ;;  %v1148_v6 = vld [vmem:[%s2313_s0 + $0x5b0] sm:$0xff] }
  0x3d   :  { %447 = vmatpush.bf16.msrb.mxu1 %v186_v19  ;;  %v1086_v37 = vld [vmem:[%s2314_s2 + $0x48] sm:$0xf]  ;;  %v1235_v40 = vld [vmem:[%s2314_s2 + $0x4c] sm:$0xf]  ;;  %v216_v42 = vpack.c.bf16 %v138_v32, %v136_v31  ;;  %v1110_v8 = vld [vmem:[%s2313_s0 + $0x480] sm:$0xff]  ;;  %v742_v10 = vpack.c.bf16 %v1148_v6, %v1146_v5 }
  0x3e   :  { %v1775_v45 = vor.u32 %v1237_v38, %v1086_v37  ;;  %v1777_v46 = vor.u32 %v1235_v40, %v1088_v41  ;;  %v1112_v9 = vld [vmem:[%s2313_s0 + $0x490] sm:$0xff]  ;;  %v1142_v12 = vld [vmem:[%s2313_s0 + $0x580] sm:$0xff]  ;;  %v1123_v41 = vld [vmem:[%s2313_s0 + $0x4e8] sm:$0xff] }
  0x3f   :  { %471 = vmatpush.bf16.msrb.mxu2 %v202_v25  ;;  %v724_v11 = vpack.c.bf16 %v1112_v9, %v1110_v8  ;;  %v1144_v13 = vld [vmem:[%s2313_s0 + $0x590] sm:$0xff]  ;;  %v1106_v15 = vld [vmem:[%s2313_s0 + $0x460] sm:$0xff]  ;;  %v1155_v48 = vld [vmem:[%s2313_s0 + $0x5e8] sm:$0xff] }
  0x40   :  { %495 = vmatpush.bf16.msrb.mxu3 %v218_v26  ;;  %424 = vmatpush.bf16.msrb.mxu0 %v168_v27  ;;  %v740_v14 = vpack.c.bf16 %v1144_v13, %v1142_v12  ;;  %v1108_v16 = vld [vmem:[%s2313_s0 + $0x470] sm:$0xff]  ;;  %v1138_v18 = vld [vmem:[%s2313_s0 + $0x560] sm:$0xff]  ;;  %v1119_v52 = vld [vmem:[%s2313_s0 + $0x4c8] sm:$0xff] }
  0x41   :  { %448 = vmatpush.bf16.msrb.mxu1 %v184_v30  ;;  %v722_v17 = vpack.c.bf16 %v1108_v16, %v1106_v15  ;;  %v1140_v19 = vld [vmem:[%s2313_s0 + $0x570] sm:$0xff]  ;;  %v1102_v20 = vld [vmem:[%s2313_s0 + $0x440] sm:$0xff]  ;;  %v1121_v54 = vld [vmem:[%s2313_s0 + $0x4d8] sm:$0xff] }
  0x42   :  { %v738_v21 = vpack.c.bf16 %v1140_v19, %v1138_v18  ;;  %v1104_v22 = vld [vmem:[%s2313_s0 + $0x450] sm:$0xff]  ;;  %v1134_v23 = vld [vmem:[%s2313_s0 + $0x540] sm:$0xff]  ;;  %v1153_v61 = vld [vmem:[%s2313_s0 + $0x5d8] sm:$0xff]  ;;  %v729_v62 = vpack.c.bf16 %v1121_v54, %v1119_v52 }
  0x43   :  { %472 = vmatpush.bf16.msrb.mxu2 %v200_v39  ;;  %v720_v24 = vpack.c.bf16 %v1104_v22, %v1102_v20  ;;  %v1136_v25 = vld [vmem:[%s2313_s0 + $0x550] sm:$0xff]  ;;  %v1098_v26 = vld [vmem:[%s2313_s0 + $0x420] sm:$0xff]  ;;  %v1115_v0 = vld [vmem:[%s2313_s0 + $0x4a8] sm:$0xff] }
  0x44   :  { %496 = vmatpush.bf16.msrb.mxu3 %v216_v42  ;;  %v1100_v27 = vld [vmem:[%s2313_s0 + $0x430] sm:$0xff]  ;;  %v525_v28 = vld [vmem:[%s2316_s1] sm:$0x7]  ;;  %v736_v29 = vpack.c.bf16 %v1136_v25, %v1134_v23  ;;  %v1222_v40 = vld [vmem:[%s2316_s1 + $0x4] sm:$0x7] }
  0x45   :  { %339 = vmatmul.bf16.gmra.mxu0 %v1771_v43  ;;  %528 = vperm.xlu0 %1239, %v525_v28   ;;  %v718_v30 = vpack.c.bf16 %v1100_v27, %v1098_v26  ;;  %v1130_v31 = vld [vmem:[%s2313_s0 + $0x520] sm:$0xff]  ;;  %v1132_v32 = vld [vmem:[%s2313_s0 + $0x530] sm:$0xff]  ;;  %v1125_v42 = vld [vmem:[%s2313_s0 + $0x4f8] sm:$0xff] }
  0x46   :  { %363 = vmatmul.bf16.gmra.mxu1 %v1773_v44  ;;  %387 = vmatmul.bf16.gmra.mxu2 %v1775_v45  ;;  %v1094_v33 = vld [vmem:[%s2313_s0 + $0x400] sm:$0xff]  ;;  %v1096_v34 = vld [vmem:[%s2313_s0 + $0x410] sm:$0xff]  ;;  %v734_v35 = vpack.c.bf16 %v1132_v32, %v1130_v31  ;;  %v731_v47 = vpack.c.bf16 %v1125_v42, %v1123_v41  ;;  %v1147_v3 = vld [vmem:[%s2313_s0 + $0x5a8] sm:$0xff] }
  0x47   :  { %411 = vmatmul.bf16.gmra.mxu3 %v1777_v46  ;;  %780 = vmatpush.bf16.msra.mxu2 %v730_v49  ;;  %v716_v36 = vpack.c.bf16 %v1096_v34, %v1094_v33  ;;  %v1126_v37 = vld [vmem:[%s2313_s0 + $0x500] sm:$0xff]  ;;  %v1128_v38 = vld [vmem:[%s2313_s0 + $0x510] sm:$0xff]  ;;  %v1157_v49 = vld [vmem:[%s2313_s0 + $0x5f8] sm:$0xff] }
  0x48   :  { %804 = vmatpush.bf16.msra.mxu3 %v746_v57  ;;  %v732_v39 = vpack.c.bf16 %v1128_v38, %v1126_v37  ;;  %988 = vperm.xlu1 %1240, %v1222_v40   ;;  %v747_v53 = vpack.c.bf16 %v1157_v49, %v1155_v48  ;;  %v1151_v57 = vld [vmem:[%s2313_s0 + $0x5c8] sm:$0xff]  ;;  %v1113_v8 = vld [vmem:[%s2313_s0 + $0x498] sm:$0xff] }
  0x49   :  { %v745_v2 = vpack.c.bf16 %v1153_v61, %v1151_v57  ;;  %v1107_v13 = vld [vmem:[%s2313_s0 + $0x468] sm:$0xff]  ;;  %v1105_v20 = vld [vmem:[%s2313_s0 + $0x458] sm:$0xff] }
  0x4a   :  { %v1139_v16 = vld [vmem:[%s2313_s0 + $0x568] sm:$0xff]  ;;  %v1137_v23 = vld [vmem:[%s2313_s0 + $0x558] sm:$0xff] }
  0x4b   :  { %781 = vmatpush.bf16.msra.mxu2 %v728_v1  ;;  %v1117_v1 = vld [vmem:[%s2313_s0 + $0x4b8] sm:$0xff]  ;;  %v1103_v19 = vld [vmem:[%s2313_s0 + $0x448] sm:$0xff] }
  0x4c   :  { %805 = vmatpush.bf16.msra.mxu3 %v744_v4  ;;  %v1149_v4 = vld [vmem:[%s2313_s0 + $0x5b8] sm:$0xff]  ;;  %v727_v5 = vpack.c.bf16 %v1117_v1, %v1115_v0  ;;  %v1135_v22 = vld [vmem:[%s2313_s0 + $0x548] sm:$0xff] }
  0x4d   :  { %v743_v6 = vpack.c.bf16 %v1149_v4, %v1147_v3  ;;  %v1099_v25 = vld [vmem:[%s2313_s0 + $0x428] sm:$0xff]  ;;  %v1101_v26 = vld [vmem:[%s2313_s0 + $0x438] sm:$0xff] }
  0x4e   :  { %v719_v27 = vpack.c.bf16 %v1101_v26, %v1099_v25  ;;  %v1131_v28 = vld [vmem:[%s2313_s0 + $0x528] sm:$0xff]  ;;  %v1097_v32 = vld [vmem:[%s2313_s0 + $0x418] sm:$0xff] }
  0x4f   :  { %782 = vmatpush.bf16.msra.mxu2 %v726_v7  ;;  %v1111_v7 = vld [vmem:[%s2313_s0 + $0x488] sm:$0xff] }
  0x50   :  { %806 = vmatpush.bf16.msra.mxu3 %v742_v10  ;;  %v725_v9 = vpack.c.bf16 %v1113_v8, %v1111_v7  ;;  %v1143_v10 = vld [vmem:[%s2313_s0 + $0x588] sm:$0xff] }
  0x51   :  { %v1095_v31 = vld [vmem:[%s2313_s0 + $0x408] sm:$0xff] }
  0x52   :  { %v717_v33 = vpack.c.bf16 %v1097_v32, %v1095_v31  ;;  %v1127_v34 = vld [vmem:[%s2313_s0 + $0x508] sm:$0xff] }
  0x53   :  { %783 = vmatpush.bf16.msra.mxu2 %v724_v11  ;;  %v1145_v11 = vld [vmem:[%s2313_s0 + $0x598] sm:$0xff] }
  0x54   :  { %807 = vmatpush.bf16.msra.mxu3 %v740_v14  ;;  %v741_v12 = vpack.c.bf16 %v1145_v11, %v1143_v10  ;;  %v1109_v14 = vld [vmem:[%s2313_s0 + $0x478] sm:$0xff] }
  0x55   :  { %425 = vmatmul.bf16.vlgmr.msrb.gmra.mxu0 %v1513_v50  ;;  %v723_v15 = vpack.c.bf16 %v1109_v14, %v1107_v13 }
  0x56   :  { %449 = vmatmul.bf16.vlgmr.msrb.gmra.mxu1 %v1524_v55  ;;  %473 = vmatmul.bf16.vlgmr.msrb.gmra.mxu2 %v1526_v56 }
  0x57   :  { %497 = vmatmul.bf16.vlgmr.msrb.gmra.mxu3 %v1534_v59  ;;  %784 = vmatpush.bf16.msra.mxu2 %v722_v17  ;;  %v1141_v17 = vld [vmem:[%s2313_s0 + $0x578] sm:$0xff] }
  0x58   :  { %808 = vmatpush.bf16.msra.mxu3 %v738_v21  ;;  %v739_v18 = vpack.c.bf16 %v1141_v17, %v1139_v16  ;;  %v721_v21 = vpack.c.bf16 %v1105_v20, %v1103_v19 }
  0x5b   :  { %785 = vmatpush.bf16.msra.mxu2 %v720_v24  ;;  %v737_v24 = vpack.c.bf16 %v1137_v23, %v1135_v22 }
  0x5c   :  { %809 = vmatpush.bf16.msra.mxu3 %v736_v29  ;;  %v1133_v29 = vld [vmem:[%s2313_s0 + $0x538] sm:$0xff] }
  0x5f   :  { %786 = vmatpush.bf16.msra.mxu2 %v718_v30  ;;  %v735_v30 = vpack.c.bf16 %v1133_v29, %v1131_v28 }
  0x60   :  { %810 = vmatpush.bf16.msra.mxu3 %v734_v35  ;;  %v1129_v35 = vld [vmem:[%s2313_s0 + $0x518] sm:$0xff] }
  0x63   :  { %787 = vmatpush.bf16.msra.mxu2 %v716_v36  ;;  %v733_v36 = vpack.c.bf16 %v1129_v35, %v1127_v34 }
  0x64   :  { %811 = vmatpush.bf16.msra.mxu3 %v732_v39 }
  0x65   :  { %430 = vmatmul.bf16.gmra.mxu0 %v1657_v51 }
  0x66   :  { %454 = vmatmul.bf16.gmra.mxu1 %v1668_v58  ;;  %478 = vmatmul.bf16.gmra.mxu2 %v1670_v60 }
  0x67   :  { %502 = vmatmul.bf16.gmra.mxu3 %v1678_v63  ;;  %876 = vmatpush.bf16.msrb.mxu2 %v731_v47 }
  0x68   :  { %900 = vmatpush.bf16.msrb.mxu3 %v747_v53 }
  0x6b   :  { %877 = vmatpush.bf16.msrb.mxu2 %v729_v62 }
  0x6c   :  { %901 = vmatpush.bf16.msrb.mxu3 %v745_v2 }
  0x6f   :  { %878 = vmatpush.bf16.msrb.mxu2 %v727_v5 }
  0x70   :  { %902 = vmatpush.bf16.msrb.mxu3 %v743_v6 }
  0x73   :  { %879 = vmatpush.bf16.msrb.mxu2 %v725_v9 }
  0x74   :  { %903 = vmatpush.bf16.msrb.mxu3 %v741_v12 }
  0x75   :  { %435 = vmatmul.bf16.gmra.mxu0 %v1771_v43 }
  0x76   :  { %459 = vmatmul.bf16.gmra.mxu1 %v1773_v44  ;;  %483 = vmatmul.bf16.gmra.mxu2 %v1775_v45 }
  0x77   :  { %507 = vmatmul.bf16.gmra.mxu3 %v1777_v46  ;;  %880 = vmatpush.bf16.msrb.mxu2 %v723_v15 }
  0x78   :  { %904 = vmatpush.bf16.msrb.mxu3 %v739_v18 }
  0x7b   :  { %881 = vmatpush.bf16.msrb.mxu2 %v721_v21 }
  0x7c   :  { %905 = vmatpush.bf16.msrb.mxu3 %v737_v24 }
  0x7f   :  { %882 = vmatpush.bf16.msrb.mxu2 %v719_v27 }
  0x80   :  { %906 = vmatpush.bf16.msrb.mxu3 %v735_v30 }
  0x83   :  { %883 = vmatpush.bf16.msrb.mxu2 %v717_v33  ;;  %v2007_v1 = vpop.permute.xlu2 %238 }
  0x84   :  { %907 = vmatpush.bf16.msrb.mxu3 %v733_v36 }
  0x86   :  { %788 = vmatmul.bf16.vlgmr.msra.gmra.mxu2 %v1513_v50 }
  0x87   :  { %812 = vmatmul.bf16.vlgmr.msra.gmra.mxu3 %v1524_v55 }
  0x8b   :  { %v2005_v0 = vpop.permute.xlu1 %248  ;;  %v2016_v11 = vpop.permute.xlu2 %233 }
  0x96   :  { %793 = vmatmul.bf16.gmra.mxu2 %v1657_v51 }
  0x97   :  { %817 = vmatmul.bf16.gmra.mxu3 %v1668_v58 }
  0xa1   :  { %v2003_v62 = vpop.permute.xlu0 %258 }
  0xa2   :  { %v330_v37 = vpop.f32.mrf.mxu0 }
  0xa3   :  { %v354_v38 = vpop.f32.mrf.mxu1 }
  0xa6   :  { %798 = vmatmul.bf16.gmra.mxu2 %v1771_v43 }
  0xa7   :  { %822 = vmatmul.bf16.gmra.mxu3 %v1773_v44 }
  0xa9   :  { %v378_v39 = vpop.f32.mrf.mxu2 }
  0xaa   :  { %v1999_v40 = vpop.f32.mrf.mxu3  ;;  %v332_v41 = vpop.f32.mrf.mxu0 }
  0xab   :  { %v356_v42 = vpop.f32.mrf.mxu1  ;;  %v2009_v6 = vpop.permute.xlu0 %253 }
  0xb1   :  { %v380_v47 = vpop.f32.mrf.mxu2 }
  0xb2   :  { %v404_v48 = vpop.f32.mrf.mxu3  ;;  %v335_v49 = vpop.f32.mrf.mxu0 }
  0xb3   :  { %v359_v52 = vpop.f32.mrf.mxu1 }
  0xb6   :  { %884 = vmatmul.bf16.vlgmr.msrb.gmra.mxu2 %v1513_v50 }
  0xb7   :  { %908 = vmatmul.bf16.vlgmr.msrb.gmra.mxu3 %v1524_v55  ;;  %v2014_v55 = vpop.permute.xlu1 %243 }
  0xb8   :  { %v336_v12 = vadd.f32 %v335_v49, %v2014_v55 }
  0xb9   :  { %v383_v53 = vpop.f32.mrf.mxu2 }
  0xba   :  { %v407_v54 = vpop.f32.mrf.mxu3  ;;  %v337_v57 = vpop.f32.mrf.mxu0  ;;  %v360_v16 = vadd.f32 %v359_v52, %v336_v12  ;;  %v1174_v12 = vld [vmem:[%s2313_s0 + $0x680] sm:$0xff] }
  0xbb   :  { %v361_v61 = vpop.f32.mrf.mxu1  ;;  %v338_v13 = vadd.f32 %v337_v57, %v2005_v0 }
  0xbc   :  { %v384_v28 = vadd.f32 %v383_v53, %v360_v16  ;;  %v1170_v16 = vld [vmem:[%s2313_s0 + $0x660] sm:$0xff] }
  0xbd   :  { %v362_v17 = vadd.f32 %v361_v61, %v338_v13  ;;  %v1182_v61 = vld [vmem:[%s2313_s0 + $0x6c0] sm:$0xff]  ;;  %v1176_v13 = vld [vmem:[%s2313_s0 + $0x690] sm:$0xff] }
  0xbe   :  { %v408_v35 = vadd.f32 %v407_v54, %v384_v28  ;;  %v2047_v54 = vld [vmem:[%s2317_s4] sm:$0x7] }
  0xbf   :  { %v1162_v28 = vld [vmem:[%s2313_s0 + $0x620] sm:$0xff] }
  0xc1   :  { %v385_v2 = vpop.f32.mrf.mxu2 }
  0xc2   :  { %v409_v3 = vpop.f32.mrf.mxu3  ;;  %v340_v4 = vpop.f32.mrf.mxu0  ;;  %v386_v21 = vadd.f32 %v385_v2, %v362_v17  ;;  %v1184_v2 = vld [vmem:[%s2313_s0 + $0x6d0] sm:$0xff] }
  0xc3   :  { %v364_v5 = vpop.f32.mrf.mxu1  ;;  %v341_v50 = vadd.f32 %v340_v4, %v2009_v6  ;;  %v1172_v17 = vld [vmem:[%s2313_s0 + $0x670] sm:$0xff] }
  0xc4   :  { %v410_v32 = vadd.f32 %v409_v3, %v386_v21  ;;  %v1168_v21 = vld [vmem:[%s2313_s0 + $0x650] sm:$0xff] }
  0xc5   :  { %v365_v14 = vadd.f32 %v364_v5, %v341_v50  ;;  %v760_v50 = vpack.c.bf16 %v1184_v2, %v1182_v61  ;;  %v1185_v61 = vld [vmem:[%s2313_s0 + $0x6d8] sm:$0xff] }
  0xc6   :  { %889 = vmatmul.bf16.gmra.mxu2 %v1657_v51  ;;  %v331_v51 = vadd.f32 %v330_v37, %v2016_v11 }
  0xc7   :  { %913 = vmatmul.bf16.gmra.mxu3 %v1668_v58  ;;  %v333_v58 = vadd.f32 %v332_v41, %v2007_v1  ;;  %v519_v41 = vmax.f32 %v410_v32, 0.0  ;;  %v1158_v32 = vld [vmem:[%s2313_s0 + $0x600] sm:$0xff] }
  0xc8   :  { %v355_v25 = vadd.f32 %v354_v38, %v331_v51 }
  0xc9   :  { %v388_v7 = vpop.f32.mrf.mxu2  ;;  %v357_v27 = vadd.f32 %v356_v42, %v333_v58  ;;  %v756_v58 = vpack.c.bf16 %v1176_v13, %v1174_v12 }
  0xca   :  { %v412_v8 = vpop.f32.mrf.mxu3  ;;  %v342_v9 = vpop.f32.mrf.mxu0  ;;  %v389_v18 = vadd.f32 %v388_v7, %v365_v14  ;;  %v379_v34 = vadd.f32 %v378_v39, %v355_v25  ;;  %v1188_v39 = vld [vmem:[%s2313_s0 + $0x6f0] sm:$0xff]  ;;  %v1178_v7 = vld [vmem:[%s2313_s0 + $0x6a0] sm:$0xff] }
  0xcb   :  { %v366_v10 = vpop.f32.mrf.mxu1  ;;  %v343_v15 = vadd.f32 %v342_v9, %v2003_v62  ;;  %v381_v31 = vadd.f32 %v380_v47, %v357_v27 }
  0xcc   :  { %v413_v29 = vadd.f32 %v412_v8, %v389_v18  ;;  %v403_v52 = vadd.f32 %v1999_v40, %v379_v34  ;;  %v1180_v8 = vld [vmem:[%s2313_s0 + $0x6b0] sm:$0xff]  ;;  %v754_v18 = vpack.c.bf16 %v1172_v17, %v1170_v16  ;;  %v1179_v17 = vld [vmem:[%s2313_s0 + $0x6a8] sm:$0xff] }
  0xcd   :  { %v367_v19 = vadd.f32 %v366_v10, %v343_v15  ;;  %v405_v38 = vadd.f32 %v404_v48, %v381_v31  ;;  %v758_v9 = vpack.c.bf16 %v1180_v8, %v1178_v7 }
  0xce   :  { %v521_v36 = vmax.f32 %v413_v29, 0.0  ;;  %v513_v53 = vmax.f32 %v403_v52, 0.0  ;;  %v1164_v29 = vld [vmem:[%s2313_s0 + $0x630] sm:$0xff] }
  0xcf   :  { %v515_v48 = vmax.f32 %v405_v38, 0.0  ;;  %v750_v31 = vpack.c.bf16 %v1164_v29, %v1162_v28  ;;  %v1187_v38 = vld [vmem:[%s2313_s0 + $0x6e8] sm:$0xff] }
  0xd0   :  { %v1175_v28 = vld [vmem:[%s2313_s0 + $0x688] sm:$0xff] }
  0xd1   :  { %v390_v20 = vpop.f32.mrf.mxu2 }
  0xd2   :  { %v391_v22 = vadd.f32 %v390_v20, %v367_v19  ;;  %v414_v23 = vpop.f32.mrf.mxu3  ;;  %v2023_v24 = vpop.f32.mrf.mxu0  ;;  %v1166_v20 = vld [vmem:[%s2313_s0 + $0x640] sm:$0xff] }
  0xd3   :  { %v2025_v26 = vpop.f32.mrf.mxu1  ;;  %v752_v25 = vpack.c.bf16 %v1168_v21, %v1166_v20  ;;  %v427_v2 = vadd.f32 %v2023_v24, %v2016_v11  ;;  %v1181_v24 = vld [vmem:[%s2313_s0 + $0x6b8] sm:$0xff] }
  0xd4   :  { %v415_v30 = vadd.f32 %v414_v23, %v391_v22 }
  0xd6   :  { %v523_v33 = vmax.f32 %v415_v30, 0.0  ;;  %894 = vmatmul.bf16.gmra.mxu2 %v1771_v43  ;;  %v517_v43 = vmax.f32 %v408_v35, 0.0 }
  0xd7   :  { %918 = vmatmul.bf16.gmra.mxu3 %v1773_v44  ;;  %v1186_v44 = vld [vmem:[%s2313_s0 + $0x6e0] sm:$0xff] }
  0xd8   :  { %545 = vmatpush.msra.mxu0 %v523_v33  ;;  %v762_v40 = vpack.c.bf16 %v1188_v39, %v1186_v44  ;;  %v1160_v33 = vld [vmem:[%s2313_s0 + $0x610] sm:$0xff] }
  0xd9   :  { %v2029_v37 = vpop.f32.mrf.mxu2  ;;  %v748_v52 = vpack.c.bf16 %v1160_v33, %v1158_v32  ;;  %v1173_v32 = vld [vmem:[%s2313_s0 + $0x678] sm:$0xff] }
  0xda   :  { %v2031_v49 = vpop.f32.mrf.mxu3  ;;  %546 = vmatpush.msra.mxu0 %v521_v36  ;;  %v2033_v42 = vpop.f32.mrf.mxu0 }
  0xdb   :  { %v2035_v47 = vpop.f32.mrf.mxu1 }
  0xdc   :  { %547 = vmatpush.msra.mxu0 %v519_v41  ;;  %v1189_v41 = vld [vmem:[%s2313_s0 + $0x6f8] sm:$0xff] }
  0xde   :  { %548 = vmatpush.msra.mxu0 %v517_v43 }
  0xe0   :  { %549 = vmatpush.msra.mxu0 %v515_v48 }
  0xe1   :  { %v2049_v57 = vpop.f32.mrf.mxu2 }
  0xe2   :  { %v2057_v3 = vpop.f32.mrf.mxu3  ;;  %550 = vmatpush.msra.mxu0 %v513_v53  ;;  %v431_v4 = vpop.f32.mrf.mxu0  ;;  %v763_v53 = vpack.c.bf16 %v1189_v41, %v1187_v38 }
  0xe3   :  { %v455_v5 = vpop.f32.mrf.mxu1  ;;  %1092 = vmatmul.msk.f32.vlgmr.msra.gmra.mxu0 %vm531_vm0, %v2047_v54  ;;  %v432_v43 = vadd.f32 %v431_v4, %v2014_v55  ;;  %v429_v4 = vadd.f32 %v2033_v42, %v2007_v1  ;;  %v451_v42 = vadd.f32 %v2025_v26, %v427_v2  ;;  %v1177_v26 = vld [vmem:[%s2313_s0 + $0x698] sm:$0xff] }
  0xe4   :  { %828 = vmatpush.bf16.msrb.mxu0 %v762_v40  ;;  %v1183_v40 = vld [vmem:[%s2313_s0 + $0x6c8] sm:$0xff] }
  0xe5   :  { %v456_v7 = vadd.f32 %v455_v5, %v432_v43  ;;  %v475_v29 = vadd.f32 %v2029_v37, %v451_v42  ;;  %v1216_v43 = vld [vmem:[%s2313_s0 + $0x7d0] sm:$0xff] }
  0xe7   :  { %v499_v37 = vadd.f32 %v2031_v49, %v475_v29  ;;  %v1169_v49 = vld [vmem:[%s2313_s0 + $0x658] sm:$0xff] }
  0xe8   :  { %829 = vmatpush.bf16.msrb.mxu0 %v760_v50 }
  0xe9   :  { %v479_v10 = vpop.f32.mrf.mxu2  ;;  %v514_v38 = vmax.f32 %v499_v37, 0.0 }
  0xea   :  { %v2073_v14 = vpop.f32.mrf.mxu3  ;;  %v433_v15 = vpop.f32.mrf.mxu0 }
  0xeb   :  { %v457_v51 = vpop.f32.mrf.mxu1  ;;  %v434_v44 = vadd.f32 %v433_v15, %v2005_v0  ;;  %v761_v15 = vpack.c.bf16 %v1185_v61, %v1183_v40  ;;  %v1210_v40 = vld [vmem:[%s2313_s0 + $0x7a0] sm:$0xff]  ;;  %v1212_v61 = vld [vmem:[%s2313_s0 + $0x7b0] sm:$0xff] }
  0xec   :  { %830 = vmatpush.bf16.msrb.mxu0 %v758_v9 }
  0xed   :  { %v458_v8 = vadd.f32 %v457_v51, %v434_v44  ;;  %v453_v51 = vadd.f32 %v2035_v47, %v429_v4  ;;  %v1159_v4 = vld [vmem:[%s2313_s0 + $0x608] sm:$0xff] }
  0xf0   :  { %831 = vmatpush.bf16.msrb.mxu0 %v756_v58 }
  0xf1   :  { %v481_v19 = vpop.f32.mrf.mxu2 }
  0xf2   :  { %v505_v22 = vpop.f32.mrf.mxu3  ;;  %v436_v23 = vpop.f32.mrf.mxu0  ;;  %v482_v58 = vadd.f32 %v481_v19, %v458_v8  ;;  %v759_v19 = vpack.c.bf16 %v1181_v24, %v1179_v17  ;;  %v1206_v8 = vld [vmem:[%s2313_s0 + $0x780] sm:$0xff]  ;;  %v1200_v24 = vld [vmem:[%s2313_s0 + $0x750] sm:$0xff] }
  0xf3   :  { %v460_v27 = vpop.f32.mrf.mxu1  ;;  %v437_v30 = vadd.f32 %v436_v23, %v2009_v6  ;;  %v477_v23 = vadd.f32 %v2049_v57, %v453_v51  ;;  %v1198_v17 = vld [vmem:[%s2313_s0 + $0x740] sm:$0xff]  ;;  %v1196_v51 = vld [vmem:[%s2313_s0 + $0x730] sm:$0xff] }
  0xf4   :  { %832 = vmatpush.bf16.msrb.mxu0 %v754_v18  ;;  %v480_v18 = vadd.f32 %v479_v10, %v456_v7  ;;  %v774_v7 = vpack.c.bf16 %v1212_v61, %v1210_v40  ;;  %v768_v42 = vpack.c.bf16 %v1200_v24, %v1198_v17 }
  0xf5   :  { %v461_v39 = vadd.f32 %v460_v27, %v437_v30  ;;  %v757_v30 = vpack.c.bf16 %v1177_v26, %v1175_v28  ;;  %v501_v57 = vadd.f32 %v2057_v3, %v477_v23  ;;  %v1220_v3 = vld [vmem:[%s2313_s0 + $0x7f0] sm:$0xff]  ;;  %v1221_v23 = vld [vmem:[%s2313_s0 + $0x7f8] sm:$0xff]  ;;  %v1215_v28 = vld [vmem:[%s2313_s0 + $0x7c8] sm:$0xff] }
  0xf6   :  { %v504_v47 = vadd.f32 %v2073_v14, %v480_v18  ;;  %v1218_v14 = vld [vmem:[%s2313_s0 + $0x7e0] sm:$0xff]  ;;  %v1217_v26 = vld [vmem:[%s2313_s0 + $0x7d8] sm:$0xff] }
  0xf7   :  { %v778_v41 = vpack.c.bf16 %v1220_v3, %v1218_v14  ;;  %v777_v29 = vpack.c.bf16 %v1217_v26, %v1215_v28  ;;  %v1201_v14 = vld [vmem:[%s2313_s0 + $0x758] sm:$0xff] }
  0xf8   :  { %833 = vmatpush.bf16.msrb.mxu0 %v752_v25  ;;  %v506_v25 = vadd.f32 %v505_v22, %v482_v58  ;;  %v518_v33 = vmax.f32 %v504_v47, 0.0  ;;  %v1204_v58 = vld [vmem:[%s2313_s0 + $0x770] sm:$0xff]  ;;  %v1211_v47 = vld [vmem:[%s2313_s0 + $0x7a8] sm:$0xff] }
  0xf9   :  { %v484_v34 = vpop.f32.mrf.mxu2 }
  0xfa   :  { %v508_v35 = vpop.f32.mrf.mxu3  ;;  %v438_v36 = vpop.f32.mrf.mxu0  ;;  %v485_v9 = vadd.f32 %v484_v34, %v461_v39  ;;  %v520_v22 = vmax.f32 %v506_v25, 0.0  ;;  %v1163_v39 = vld [vmem:[%s2313_s0 + $0x628] sm:$0xff] }
  0xfb   :  { %v439_v48 = vadd.f32 %v438_v36, %v2003_v62  ;;  %v462_v50 = vpop.f32.mrf.mxu1  ;;  %v1167_v36 = vld [vmem:[%s2313_s0 + $0x648] sm:$0xff] }
  0xfc   :  { %834 = vmatpush.bf16.msrb.mxu0 %v750_v31  ;;  %v509_v20 = vadd.f32 %v508_v35, %v485_v9  ;;  %v1171_v31 = vld [vmem:[%s2313_s0 + $0x668] sm:$0xff]  ;;  %v516_v35 = vmax.f32 %v501_v57, 0.0  ;;  %v753_v44 = vpack.c.bf16 %v1169_v49, %v1167_v36  ;;  %v1208_v9 = vld [vmem:[%s2313_s0 + $0x790] sm:$0xff] }
  0xfd   :  { %v463_v12 = vadd.f32 %v462_v50, %v439_v48  ;;  %v755_v34 = vpack.c.bf16 %v1173_v32, %v1171_v31  ;;  %v1165_v48 = vld [vmem:[%s2313_s0 + $0x638] sm:$0xff]  ;;  %v1207_v57 = vld [vmem:[%s2313_s0 + $0x788] sm:$0xff] }
  0xfe   :  { %v522_v10 = vmax.f32 %v509_v20, 0.0  ;;  %v751_v2 = vpack.c.bf16 %v1165_v48, %v1163_v39  ;;  %v1161_v50 = vld [vmem:[%s2313_s0 + $0x618] sm:$0xff]  ;;  %v1190_v20 = vld [vmem:[%s2313_s0 + $0x700] sm:$0xff]  ;;  %v1203_v32 = vld [vmem:[%s2313_s0 + $0x768] sm:$0xff] }
  0xff   :  { %v1191_v49 = vld [vmem:[%s2313_s0 + $0x708] sm:$0xff] }
 0x100   :  { %835 = vmatpush.bf16.msrb.mxu0 %v748_v52  ;;  %v1214_v52 = vld [vmem:[%s2313_s0 + $0x7c0] sm:$0xff] }
 0x101   :  { %v486_v13 = vpop.f32.mrf.mxu2 }
 0x102   :  { %v487_v16 = vadd.f32 %v486_v13, %v463_v12  ;;  %v510_v5 = vpop.f32.mrf.mxu3  ;;  %v749_v12 = vpack.c.bf16 %v1161_v50, %v1159_v4  ;;  %v772_v13 = vpack.c.bf16 %v1208_v9, %v1206_v8 }
 0x103   :  { %836 = vmatmul.bf16.vlgmr.msrb.gmra.mxu0 %v1526_v56 }
 0x104   :  { %924 = vmatpush.bf16.msra.mxu0 %v763_v53  ;;  %v511_v21 = vadd.f32 %v510_v5, %v487_v16  ;;  %v776_v53 = vpack.c.bf16 %v1216_v43, %v1214_v52  ;;  %v1194_v5 = vld [vmem:[%s2313_s0 + $0x720] sm:$0xff]  ;;  %v529_v52 = vpop.permute.xlu0 %528 }
 0x105   :  { %v766_v18 = vpack.c.bf16 %v1196_v51, %v1194_v5 }
 0x106   :  { %v524_v27 = vmax.f32 %v511_v21, 0.0  ;;  %v1192_v21 = vld [vmem:[%s2313_s0 + $0x710] sm:$0xff] }
 0x107   :  { %v764_v25 = vpack.c.bf16 %v1192_v21, %v1190_v20 }
 0x108   :  { %925 = vmatpush.bf16.msra.mxu0 %v761_v15  ;;  %565 = vmatpush.msra.mxu1 %v524_v27  ;;  %v1202_v15 = vld [vmem:[%s2313_s0 + $0x760] sm:$0xff] }
 0x109   :  { %v770_v16 = vpack.c.bf16 %v1204_v58, %v1202_v15  ;;  %v789_v43 = vpop.f32.mrf.mxu2 }
 0x10a   :  { %566 = vmatpush.msra.mxu1 %v522_v10  ;;  %v1213_v10 = vld [vmem:[%s2313_s0 + $0x7b8] sm:$0xff]  ;;  %v813_v40 = vpop.f32.mrf.mxu3 }
 0x10c   :  { %926 = vmatpush.bf16.msra.mxu0 %v759_v19  ;;  %567 = vmatpush.msra.mxu1 %v520_v22  ;;  %v1219_v19 = vld [vmem:[%s2313_s0 + $0x7e8] sm:$0xff]  ;;  %v1209_v22 = vld [vmem:[%s2313_s0 + $0x798] sm:$0xff] }
 0x10d   :  { %v779_v27 = vpack.c.bf16 %v1221_v23, %v1219_v19  ;;  %v773_v31 = vpack.c.bf16 %v1209_v22, %v1207_v57 }
 0x10e   :  { %568 = vmatpush.msra.mxu1 %v518_v33  ;;  %v1199_v33 = vld [vmem:[%s2313_s0 + $0x748] sm:$0xff] }
 0x10f   :  { %v769_v3 = vpack.c.bf16 %v1201_v14, %v1199_v33 }
 0x110   :  { %927 = vmatpush.bf16.msra.mxu0 %v757_v30  ;;  %569 = vmatpush.msra.mxu1 %v516_v35  ;;  %v775_v30 = vpack.c.bf16 %v1213_v10, %v1211_v47  ;;  %v1197_v35 = vld [vmem:[%s2313_s0 + $0x738] sm:$0xff] }
 0x112   :  { %570 = vmatpush.msra.mxu1 %v514_v38  ;;  %v1193_v38 = vld [vmem:[%s2313_s0 + $0x718] sm:$0xff]  ;;  %v815_v4 = vpop.f32.mrf.mxu3 }
 0x113   :  { %841 = vmatmul.bf16.gmra.mxu0 %v1670_v60  ;;  %1093 = vmatmul.msk.f32.vlgmr.msra.gmra.mxu1 %vm531_vm0, %v2047_v54 }
 0x114   :  { %928 = vmatpush.bf16.msra.mxu0 %v755_v34  ;;  %852 = vmatpush.bf16.msrb.mxu1 %v778_v41  ;;  %v1195_v34 = vld [vmem:[%s2313_s0 + $0x728] sm:$0xff]  ;;  %v765_v41 = vpack.c.bf16 %v1193_v38, %v1191_v49 }
 0x115   :  { %v767_v36 = vpack.c.bf16 %v1197_v35, %v1195_v34 }
 0x118   :  { %929 = vmatpush.bf16.msra.mxu0 %v753_v44  ;;  %853 = vmatpush.bf16.msrb.mxu1 %v776_v53 }
 0x11a   :  { %v818_v8 = vpop.f32.mrf.mxu3 }
 0x11c   :  { %930 = vmatpush.bf16.msra.mxu0 %v751_v2  ;;  %854 = vmatpush.bf16.msrb.mxu1 %v774_v7 }
 0x120   :  { %931 = vmatpush.bf16.msra.mxu0 %v749_v12  ;;  %855 = vmatpush.bf16.msrb.mxu1 %v772_v13 }
 0x122   :  { %v820_v15 = vpop.f32.mrf.mxu3 }
 0x123   :  { %846 = vmatmul.bf16.gmra.mxu0 %v1775_v45 }
 0x124   :  { %856 = vmatpush.bf16.msrb.mxu1 %v770_v16 }
 0x128   :  { %857 = vmatpush.bf16.msrb.mxu1 %v768_v42 }
 0x12a   :  { %v823_v24 = vpop.f32.mrf.mxu3 }
 0x12c   :  { %858 = vmatpush.bf16.msrb.mxu1 %v766_v18 }
 0x130   :  { %859 = vmatpush.bf16.msrb.mxu1 %v764_v25 }
 0x132   :  { %v825_v18 = vpop.f32.mrf.mxu3 }
 0x133   :  { %860 = vmatmul.bf16.vlgmr.msrb.gmra.mxu1 %v1534_v59  ;;  %932 = vmatmul.bf16.vlgmr.msra.gmra.mxu0 %v1526_v56  ;;  %v1205_v56 = vld [vmem:[%s2313_s0 + $0x778] sm:$0xff] }
 0x134   :  { %948 = vmatpush.bf16.msra.mxu1 %v779_v27  ;;  %v771_v37 = vpack.c.bf16 %v1205_v56, %v1203_v32 }
 0x138   :  { %949 = vmatpush.bf16.msra.mxu1 %v777_v29 }
 0x13a   :  { %v2284_v23 = vpop.f32.mrf.mxu3 }
 0x13c   :  { %950 = vmatpush.bf16.msra.mxu1 %v775_v30 }
 0x140   :  { %951 = vmatpush.bf16.msra.mxu1 %v773_v31 }
 0x143   :  { %865 = vmatmul.bf16.gmra.mxu1 %v1678_v63  ;;  %937 = vmatmul.bf16.gmra.mxu0 %v1670_v60 }
 0x144   :  { %952 = vmatpush.bf16.msra.mxu1 %v771_v37  ;;  %v790_v37 = vadd.f32 %v789_v43, %v2016_v11 }
 0x148   :  { %953 = vmatpush.bf16.msra.mxu1 %v769_v3 }
 0x14c   :  { %954 = vmatpush.bf16.msra.mxu1 %v767_v36  ;;  %v911_v36 = vpop.f32.mrf.mxu3 }
 0x150   :  { %955 = vmatpush.bf16.msra.mxu1 %v765_v41 }
 0x153   :  { %870 = vmatmul.bf16.gmra.mxu1 %v1777_v46  ;;  %942 = vmatmul.bf16.gmra.mxu0 %v1775_v45 }
 0x160   :  { %v552_v60 = vpop.f32.mrf.mxu0 }
 0x161   :  { %v553_v39 = vadd.f32 %v552_v60, %v529_v52 }
 0x163   :  { %956 = vmatmul.bf16.vlgmr.msra.gmra.mxu1 %v1534_v59  ;;  %v575_v61 = vmax.f32 %v553_v39, 0.0 }
 0x173   :  { %961 = vmatmul.bf16.gmra.mxu1 %v1678_v63 }
 0x180   :  { %v837_v59 = vpop.f32.mrf.mxu0 }
 0x183   :  { %966 = vmatmul.bf16.gmra.mxu1 %v1777_v46  ;;  %v791_v46 = vpop.f32.mrf.mxu2 }
 0x184   :  { %v792_v22 = vadd.f32 %v791_v46, %v2007_v1 }
 0x186   :  { %v816_v49 = vadd.f32 %v815_v4, %v792_v22  ;;  %v914_v4 = vpop.f32.mrf.mxu3 }
 0x188   :  { %v839_v50 = vpop.f32.mrf.mxu0 }
 0x189   :  { %v840_v39 = vadd.f32 %v839_v50, %v816_v49 }
 0x18b   :  { %v794_v7 = vpop.f32.mrf.mxu2 }
 0x18c   :  { %v795_v47 = vadd.f32 %v794_v7, %v2014_v55 }
 0x18e   :  { %v819_v14 = vadd.f32 %v818_v8, %v795_v47  ;;  %v916_v50 = vpop.f32.mrf.mxu3 }
 0x190   :  { %v572_v44 = vpop.f32.mrf.mxu1  ;;  %v842_v9 = vpop.f32.mrf.mxu0 }
 0x191   :  { %v573_v48 = vadd.f32 %v572_v44, %v529_v52  ;;  %v843_v38 = vadd.f32 %v842_v9, %v819_v14  ;;  %v814_v44 = vadd.f32 %v813_v40, %v790_v37 }
 0x193   :  { %v576_v53 = vmax.f32 %v573_v48, 0.0  ;;  %v796_v12 = vpop.f32.mrf.mxu2 }
 0x194   :  { %v797_v29 = vadd.f32 %v796_v12, %v2005_v0 }
 0x195   :  { %v579_v2 = vrot.slane %v576_v53, 4 }
 0x196   :  { %v821_v31 = vadd.f32 %v820_v15, %v797_v29 }
 0x197   :  { %v581_v63 = vsel %vm580_vm3, %v575_v61, %v579_v2  ;;  %v838_v61 = vadd.f32 %v837_v59, %v814_v44 }
 0x198   :  { %586 = vst.msk [vmem:[%s2318_s5] sm:$0x77] %vm2272_vm4, %v581_v63  ;;  %v844_v58 = vpop.f32.mrf.mxu0 }
 0x199   :  { %v845_v3 = vadd.f32 %v844_v58, %v821_v31 }
 0x19b   :  { %v799_v16 = vpop.f32.mrf.mxu2 }
 0x19c   :  { %v800_v27 = vadd.f32 %v799_v16, %v2009_v6 }
 0x19e   :  { %v824_v10 = vadd.f32 %v823_v24, %v800_v27  ;;  %v919_v24 = vpop.f32.mrf.mxu3 }
 0x1a0   :  { %v847_v42 = vpop.f32.mrf.mxu0 }
 0x1a1   :  { %v848_v32 = vadd.f32 %v847_v42, %v824_v10 }
 0x1a3   :  { %v801_v51 = vpop.f32.mrf.mxu2 }
 0x1a4   :  { %v802_v28 = vadd.f32 %v801_v51, %v2003_v62 }
 0x1a6   :  { %v826_v30 = vadd.f32 %v825_v18, %v802_v28 }
 0x1a8   :  { %v849_v20 = vpop.f32.mrf.mxu0 }
 0x1a9   :  { %v850_v56 = vadd.f32 %v849_v20, %v826_v30 }
 0x1ab   :  { %v2282_v19 = vpop.f32.mrf.mxu2 }
 0x1b0   :  { %v861_v13 = vpop.f32.mrf.mxu1  ;;  %v2288_v26 = vpop.f32.mrf.mxu0 }
 0x1b1   :  { %v862_v7 = vadd.f32 %v861_v13, %v838_v61 }
 0x1b3   :  { %v887_v57 = vpop.f32.mrf.mxu2  ;;  %v972_v9 = vmax.f32 %v862_v7, 0.0 }
 0x1b4   :  { %v888_v10 = vadd.f32 %v887_v57, %v2007_v1 }
 0x1b6   :  { %v912_v14 = vadd.f32 %v911_v36, %v888_v10 }
 0x1b8   :  { %v863_v17 = vpop.f32.mrf.mxu1  ;;  %v935_v52 = vpop.f32.mrf.mxu0 }
 0x1b9   :  { %v864_v2 = vadd.f32 %v863_v17, %v840_v39 }
 0x1bb   :  { %v890_v43 = vpop.f32.mrf.mxu2  ;;  %v974_v12 = vmax.f32 %v864_v2, 0.0 }
 0x1bc   :  { %v891_v28 = vadd.f32 %v890_v43, %v2014_v55 }
 0x1c0   :  { %v866_v5 = vpop.f32.mrf.mxu1  ;;  %v938_v15 = vpop.f32.mrf.mxu0 }
 0x1c1   :  { %v867_v48 = vadd.f32 %v866_v5, %v843_v38 }
 0x1c3   :  { %v976_v8 = vmax.f32 %v867_v48, 0.0  ;;  %v892_v59 = vpop.f32.mrf.mxu2 }
 0x1c8   :  { %v868_v21 = vpop.f32.mrf.mxu1  ;;  %v940_v58 = vpop.f32.mrf.mxu0 }
 0x1c9   :  { %v869_v41 = vadd.f32 %v868_v21, %v845_v3  ;;  %v921_v21 = vpop.f32.mrf.mxu3 }
 0x1cb   :  { %v978_v63 = vmax.f32 %v869_v41, 0.0  ;;  %v895_v17 = vpop.f32.mrf.mxu2 }
 0x1cc   :  { %v896_v18 = vadd.f32 %v895_v17, %v2009_v6  ;;  %v915_v6 = vadd.f32 %v914_v4, %v891_v28 }
 0x1ce   :  { %v920_v29 = vadd.f32 %v919_v24, %v896_v18 }
 0x1d0   :  { %v871_v25 = vpop.f32.mrf.mxu1  ;;  %v943_v42 = vpop.f32.mrf.mxu0 }
 0x1d1   :  { %v872_v34 = vadd.f32 %v871_v25, %v848_v32  ;;  %v893_v25 = vadd.f32 %v892_v59, %v2005_v0  ;;  %v944_v22 = vadd.f32 %v943_v42, %v920_v29  ;;  %v886_v32 = vadd.f32 %v2282_v19, %v2016_v11 }
 0x1d2   :  { %v939_v0 = vadd.f32 %v938_v15, %v915_v6 }
 0x1d3   :  { %v980_v53 = vmax.f32 %v872_v34, 0.0  ;;  %v897_v5 = vpop.f32.mrf.mxu2  ;;  %v917_v30 = vadd.f32 %v916_v50, %v893_v25  ;;  %v910_v55 = vadd.f32 %v2284_v23, %v886_v32 }
 0x1d4   :  { %v898_v20 = vadd.f32 %v897_v5, %v2003_v62 }
 0x1d5   :  { %v941_v37 = vadd.f32 %v940_v58, %v917_v30  ;;  %v934_v57 = vadd.f32 %v2288_v26, %v910_v55 }
 0x1d6   :  { %v922_v47 = vadd.f32 %v921_v21, %v898_v20 }
 0x1d8   :  { %v873_v33 = vpop.f32.mrf.mxu1  ;;  %v945_v27 = vpop.f32.mrf.mxu0 }
 0x1d9   :  { %v874_v35 = vadd.f32 %v873_v33, %v850_v56  ;;  %v946_v31 = vadd.f32 %v945_v27, %v922_v47 }
 0x1db   :  { %v982_v60 = vmax.f32 %v874_v35, 0.0  ;;  %v936_v35 = vadd.f32 %v935_v52, %v912_v14  ;;  %v989_v52 = vpop.permute.xlu1 %988 }
 0x1dd   :  { %1001 = vmatpush.msra.mxu2 %v982_v60 }
 0x1df   :  { %1002 = vmatpush.msra.mxu2 %v980_v53 }
 0x1e0   :  { %v957_v46 = vpop.f32.mrf.mxu1 }
 0x1e1   :  { %1003 = vmatpush.msra.mxu2 %v978_v63  ;;  %v958_v11 = vadd.f32 %v957_v46, %v934_v57 }
 0x1e3   :  { %1004 = vmatpush.msra.mxu2 %v976_v8  ;;  %v973_v36 = vmax.f32 %v958_v11, 0.0 }
 0x1e5   :  { %1005 = vmatpush.msra.mxu2 %v974_v12 }
 0x1e7   :  { %1006 = vmatpush.msra.mxu2 %v972_v9 }
 0x1e8   :  { %v959_v40 = vpop.f32.mrf.mxu1  ;;  %1223 = vmatmul.msk.f32.vlgmr.msra.gmra.mxu2 %vm531_vm0, %v2047_v54 }
 0x1e9   :  { %v960_v38 = vadd.f32 %v959_v40, %v936_v35 }
 0x1eb   :  { %v975_v60 = vmax.f32 %v960_v38, 0.0 }
 0x1f0   :  { %v962_v16 = vpop.f32.mrf.mxu1 }
 0x1f1   :  { %v963_v49 = vadd.f32 %v962_v16, %v939_v0 }
 0x1f3   :  { %v977_v19 = vmax.f32 %v963_v49, 0.0 }
 0x1f8   :  { %v964_v13 = vpop.f32.mrf.mxu1 }
 0x1f9   :  { %v965_v3 = vadd.f32 %v964_v13, %v941_v37 }
 0x1fb   :  { %v979_v41 = vmax.f32 %v965_v3, 0.0 }
 0x200   :  { %v967_v51 = vpop.f32.mrf.mxu1 }
 0x201   :  { %v968_v62 = vadd.f32 %v967_v51, %v944_v22 }
 0x203   :  { %v981_v1 = vmax.f32 %v968_v62, 0.0 }
 0x208   :  { %v969_v56 = vpop.f32.mrf.mxu1 }
 0x209   :  { %v970_v33 = vadd.f32 %v969_v56, %v946_v31 }
 0x20b   :  { %v983_v34 = vmax.f32 %v970_v33, 0.0 }
 0x20d   :  { %1021 = vmatpush.msra.mxu3 %v983_v34 }
 0x20f   :  { %1022 = vmatpush.msra.mxu3 %v981_v1 }
 0x211   :  { %1023 = vmatpush.msra.mxu3 %v979_v41 }
 0x213   :  { %1024 = vmatpush.msra.mxu3 %v977_v19 }
 0x215   :  { %1025 = vmatpush.msra.mxu3 %v975_v60 }
 0x217   :  { %1026 = vmatpush.msra.mxu3 %v973_v36 }
 0x218   :  { %1224 = vmatmul.msk.f32.vlgmr.msra.gmra.mxu3 %vm531_vm0, %v2047_v54 }
 0x26b   :  { %v1008_v23 = vpop.f32.mrf.mxu2 }
 0x26c   :  { %v1009_v39 = vadd.f32 %v1008_v23, %v989_v52 }
 0x26e   :  { %v1031_v53 = vmax.f32 %v1009_v39, 0.0 }
 0x29b   :  { %v1028_v44 = vpop.f32.mrf.mxu3 }
 0x29c   :  { %v1029_v48 = vadd.f32 %v1028_v44, %v989_v52 }
 0x29e   :  { %v1032_v26 = vmax.f32 %v1029_v48, 0.0 }
 0x2a0   :  { %v1035_v61 = vrot.slane %v1032_v26, 4 }
 0x2a2   :  { %v1036_v2 = vsel %vm580_vm3, %v1031_v53, %v1035_v61 }
 0x2a3   :  { %1225 = vst.msk [vmem:[%s2318_s5 + $0x8] sm:$0x77] %vm2272_vm4, %v1036_v2 }

</bundles_post_ra>
